<compile_context>
chip_gen: v6e
topology: v6e:2x2x1
jax: 0.10.0
libtpu: 0.0.40
codegen_flags: <defaults>
</compile_context>

<pallas_src>
import jax
import jax.numpy as jnp
from jax.experimental import pallas as pl
from jax.experimental.pallas import tpu as pltpu


def _const_net_kernel(xT_ref,
                      w1_ref, b1_ref,
                      w2_ref, b2_ref,
                      w3_ref, b3_ref,
                      w4t_ref, b4_ref,
                      out_ref):
    """Fused 4-layer MLP on a transposed (feature, TILE_M) tile.

    Layer 1 / 4 (K or N == 4) run on the VPU; layers 2 / 3 (64x64) on the MXU.
    """
    # ---- layer 1 (encoder Linear(input_dim, H) + ReLU) on the VPU ------------------
    x = xT_ref[...].astype(jnp.float32)            # (D_in, TILE_M)
    w1 = w1_ref[...]                               # (H, D_in) f32
    d_in = x.shape[0]
    acc = w1[:, 0:1] * x[0:1, :]                   # (H,1)*(1,TILE_M) -> (H, TILE_M)
    for c in range(1, d_in):
        acc = acc + w1[:, c:c + 1] * x[c:c + 1, :]
    h = jnp.maximum(acc + b1_ref[...], 0.0)        # (H, TILE_M) f32

    # ---- layers 2 & 3 (H x H) on the MXU, f32 accumulation --------------------------
    mxu_dtype = w2_ref.dtype
    prec = jax.lax.Precision.HIGHEST if mxu_dtype == jnp.float32 else None

    h = jnp.dot(w2_ref[...], h.astype(mxu_dtype),
                preferred_element_type=jnp.float32, precision=prec)
    h = jnp.maximum(h + b2_ref[...], 0.0)

    h = jnp.dot(w3_ref[...], h.astype(mxu_dtype),
                preferred_element_type=jnp.float32, precision=prec)
    h = jnp.maximum(h + b3_ref[...], 0.0)          # (H, TILE_M) f32

    # ---- layer 4 (decoder Linear(H, output_dim), no activation) on the VPU/XLU ------
    w4t = w4t_ref[...]                             # (H, D_out) f32
    b4 = b4_ref[...]                               # (D_out, 1) f32
    d_out = w4t.shape[1]
    for c in range(d_out):
        yc = jnp.sum(w4t[:, c:c + 1] * h, axis=0, keepdims=True) + b4[c:c + 1, :]
        out_ref[c:c + 1, :] = yc.astype(out_ref.dtype)   # lane-dense row store


def _choose_tile_m(m, max_tile_m=4096, target_grid_steps=8, min_tile_m=512):
    """Tile over M: multiple of 128 (lane width), large enough to amortize per-step
    overhead, small enough to keep >= target_grid_steps steps (v7x megacore) and stay
    comfortably under the v5e 16 MiB scoped-VMEM default."""
    m_aligned = pl.cdiv(m, 128) * 128
    if m_aligned <= min_tile_m:
        return m_aligned
    per_step = (m_aligned // target_grid_steps) // 128 * 128
    return min(max_tile_m, m_aligned, max(per_step, min_tile_m))


def const_net_forward(x, params, *, use_bf16=True, max_tile_m=4096):
    """x: (batch, nstep, input_dim) -> (batch, nstep, output_dim)."""
    batch, nstep, input_dim = x.shape
    w1, b1, w2, b2, w3, b3, w4, b4 = params
    output_dim = w4.shape[0]

    m = batch * nstep
    tile_m = _choose_tile_m(m, max_tile_m)
    m_pad = pl.cdiv(m, tile_m) * tile_m

    x_dtype = jnp.bfloat16 if use_bf16 else x.dtype
    mxu_dtype = jnp.bfloat16 if use_bf16 else jnp.float32

    # Layout plumbing: put the large M axis on lanes (last dim).
    # TODO(synk): this transpose (and the inverse one below) is an extra HBM pass; remove
    # it by keeping the caller in (feature, M) layout if this wrapper dominates a profile.
    xT = x.reshape(m, input_dim).astype(x_dtype).T          # (D_in, M)
    if m_pad != m:
        xT = jnp.pad(xT, ((0, 0), (0, m_pad - m)))

    # MXU operands in bf16 (fast path); VPU-layer params and biases stay f32.
    w2c = w2.astype(mxu_dtype)
    w3c = w3.astype(mxu_dtype)
    w4t = w4.T                                               # (H, D_out): lane-sliced in-kernel
    params_in = (w1, b1, w2c, b2, w3c, b3, w4t, b4)

    grid = (m_pad // tile_m,)
    in_specs = [pl.BlockSpec((input_dim, tile_m), lambda i: (0, i))]   # streamed x tiles
    for p in params_in:                                                # resident params
        in_specs.append(pl.BlockSpec(p.shape, lambda i: (0, 0)))
    out_spec = pl.BlockSpec((output_dim, tile_m), lambda i: (0, i))    # streamed, lane-dense

    outT = pl.pallas_call(
        _const_net_kernel,
        out_shape=jax.ShapeDtypeStruct((output_dim, m_pad), jnp.float32),
        grid=grid,
        in_specs=in_specs,
        out_specs=out_spec,
        compiler_params=pltpu.CompilerParams(
            dimension_semantics=("parallel",),   # shard M grid across v7x's 2 TCs
        ),
    )(xT, *params_in)

    out = outT[:, :m].T.reshape(batch, nstep, output_dim).astype(x.dtype)
    return out


def init_params(key, input_dim, hidden_dim, output_dim):
    """Deterministic init mimicking PyTorch Linear default (uniform +/- 1/sqrt(fan_in)).

    Weights stored PyTorch-native as (out_features, in_features); biases as
    (out_features, 1) so they broadcast across the lane (M) axis inside the kernel.
    """
    dims = [(hidden_dim, input_dim),
            (hidden_dim, hidden_dim),
            (hidden_dim, hidden_dim),
            (output_dim, hidden_dim)]
    params = []
    keys = jax.random.split(key, 2 * len(dims))
    for i, (fan_out, fan_in) in enumerate(dims):
        bound = 1.0 / jnp.sqrt(fan_in)
        w = jax.random.uniform(keys[2 * i], (fan_out, fan_in),
                               minval=-bound, maxval=bound, dtype=jnp.float32)
        b = jax.random.uniform(keys[2 * i + 1], (fan_out, 1),
                               minval=-bound, maxval=bound, dtype=jnp.float32)
        params.extend([w, b])
    return tuple(params)


def _reference_forward(x, params):
    """Pure-JAX reference of the same forward pass (row-major formulation, f32)."""
    w1, b1, w2, b2, w3, b3, w4, b4 = params
    b, t, d = x.shape
    with jax.default_matmul_precision("highest"):
        h = x.reshape(b * t, d)
        h = jnp.maximum(h @ w1.T + b1.T, 0.0)
        h = jnp.maximum(h @ w2.T + b2.T, 0.0)
        h = jnp.maximum(h @ w3.T + b3.T, 0.0)
        y = h @ w4.T + b4.T
    return y.reshape(b, t, -1)


if __name__ == "__main__":
    # Small shapes consistent with forward(x: (batch, nstep, input_dim)); hidden_dim=64
    # (module default); output_dim=None in the module -> equals input_dim.
    batch, nstep, input_dim, hidden_dim = 2, 8, 4, 64
    output_dim = input_dim

    key = jax.random.PRNGKey(0)
    k_x, k_p, k_x2 = jax.random.split(key, 3)

    x = jax.random.normal(k_x, (batch, nstep, input_dim), dtype=jnp.float32)
    params = init_params(k_p, input_dim, hidden_dim, output_dim)
    ref = _reference_forward(x, params)

    # Full-f32 path (precision=HIGHEST on the MXU dots): tight agreement with reference.
    out_f32 = jax.block_until_ready(const_net_forward(x, params, use_bf16=False))
    assert out_f32.shape == (batch, nstep, output_dim)
    assert jnp.allclose(out_f32, ref, atol=1e-5, rtol=1e-5)

    # bf16-MXU fast path: relaxed tolerance (bf16 operands, f32 accumulation).
    out_bf16 = jax.block_until_ready(const_net_forward(x, params, use_bf16=True))
    assert out_bf16.shape == (batch, nstep, output_dim)
    assert jnp.allclose(out_bf16, ref, atol=2e-2, rtol=2e-2)

    # Multi-tile grid + M-padding path (exercises grid > 1 and the padded-tail slice).
    x2 = jax.random.normal(k_x2, (20, 33, input_dim), dtype=jnp.float32)
    out2 = jax.block_until_ready(const_net_forward(x2, params, use_bf16=True))
    ref2 = _reference_forward(x2, params)
    assert out2.shape == (20, 33, output_dim)
    assert jnp.allclose(out2, ref2, atol=2e-2, rtol=2e-2)

    print("KERNEL_OK")
</pallas_src>

<mosaic_0001>
module attributes {stable_mosaic.version = 11 : i64} {
  func.func @_const_net_kernel(%arg0: i32, %arg1: memref<4x128xf32, #tpu.memory_space<vmem>>, %arg2: memref<64x4xf32, #tpu.memory_space<vmem>>, %arg3: memref<64x1xf32, #tpu.memory_space<vmem>>, %arg4: memref<64x64xf32, #tpu.memory_space<vmem>>, %arg5: memref<64x1xf32, #tpu.memory_space<vmem>>, %arg6: memref<64x64xf32, #tpu.memory_space<vmem>>, %arg7: memref<64x1xf32, #tpu.memory_space<vmem>>, %arg8: memref<64x4xf32, #tpu.memory_space<vmem>>, %arg9: memref<4x1xf32, #tpu.memory_space<vmem>>, %arg10: memref<4x128xf32, #tpu.memory_space<vmem>>) attributes {dimension_semantics = [#tpu.dimension_semantics<parallel>], iteration_bounds = array<i64: 1>, scalar_prefetch = 0 : i64, scratch_operands = 0 : i64, tpu.core_type = #tpu.core_type<tc>, window_params = [{transform_indices = @transform_0, window_bounds = array<i64: 4, 128>}, {pipeline_mode = #tpu.pipeline_mode<synchronous>, transform_indices = @transform_1, window_bounds = array<i64: 64, 4>}, {pipeline_mode = #tpu.pipeline_mode<synchronous>, transform_indices = @transform_2, window_bounds = array<i64: 64, 1>}, {pipeline_mode = #tpu.pipeline_mode<synchronous>, transform_indices = @transform_3, window_bounds = array<i64: 64, 64>}, {pipeline_mode = #tpu.pipeline_mode<synchronous>, transform_indices = @transform_4, window_bounds = array<i64: 64, 1>}, {pipeline_mode = #tpu.pipeline_mode<synchronous>, transform_indices = @transform_5, window_bounds = array<i64: 64, 64>}, {pipeline_mode = #tpu.pipeline_mode<synchronous>, transform_indices = @transform_6, window_bounds = array<i64: 64, 1>}, {pipeline_mode = #tpu.pipeline_mode<synchronous>, transform_indices = @transform_7, window_bounds = array<i64: 64, 4>}, {pipeline_mode = #tpu.pipeline_mode<synchronous>, transform_indices = @transform_8, window_bounds = array<i64: 4, 1>}, {transform_indices = @transform_9, window_bounds = array<i64: 4, 128>}]} {
    %c0 = arith.constant 0 : index
    %c0_0 = arith.constant 0 : index
    %0 = vector.load %arg1[%c0, %c0_0] : memref<4x128xf32, #tpu.memory_space<vmem>>, vector<4x128xf32>
    %c0_1 = arith.constant 0 : index
    %c0_2 = arith.constant 0 : index
    %1 = vector.load %arg2[%c0_1, %c0_2] : memref<64x4xf32, #tpu.memory_space<vmem>>, vector<64x4xf32>
    %2 = vector.extract_strided_slice %1 {offsets = [0, 0], sizes = [64, 1], strides = [1, 1]} : vector<64x4xf32> to vector<64x1xf32>
    %3 = vector.extract_strided_slice %0 {offsets = [0, 0], sizes = [1, 128], strides = [1, 1]} : vector<4x128xf32> to vector<1x128xf32>
    %4 = vector.broadcast %2 : vector<64x1xf32> to vector<64x128xf32>
    %5 = vector.broadcast %3 : vector<1x128xf32> to vector<64x128xf32>
    %6 = arith.mulf %4, %5 : vector<64x128xf32>
    %7 = vector.extract_strided_slice %1 {offsets = [0, 1], sizes = [64, 1], strides = [1, 1]} : vector<64x4xf32> to vector<64x1xf32>
    %8 = vector.extract_strided_slice %0 {offsets = [1, 0], sizes = [1, 128], strides = [1, 1]} : vector<4x128xf32> to vector<1x128xf32>
    %9 = vector.broadcast %7 : vector<64x1xf32> to vector<64x128xf32>
    %10 = vector.broadcast %8 : vector<1x128xf32> to vector<64x128xf32>
    %11 = arith.mulf %9, %10 : vector<64x128xf32>
    %12 = arith.addf %6, %11 : vector<64x128xf32>
    %13 = vector.extract_strided_slice %1 {offsets = [0, 2], sizes = [64, 1], strides = [1, 1]} : vector<64x4xf32> to vector<64x1xf32>
    %14 = vector.extract_strided_slice %0 {offsets = [2, 0], sizes = [1, 128], strides = [1, 1]} : vector<4x128xf32> to vector<1x128xf32>
    %15 = vector.broadcast %13 : vector<64x1xf32> to vector<64x128xf32>
    %16 = vector.broadcast %14 : vector<1x128xf32> to vector<64x128xf32>
    %17 = arith.mulf %15, %16 : vector<64x128xf32>
    %18 = arith.addf %12, %17 : vector<64x128xf32>
    %19 = vector.extract_strided_slice %1 {offsets = [0, 3], sizes = [64, 1], strides = [1, 1]} : vector<64x4xf32> to vector<64x1xf32>
    %20 = vector.extract_strided_slice %0 {offsets = [3, 0], sizes = [1, 128], strides = [1, 1]} : vector<4x128xf32> to vector<1x128xf32>
    %21 = vector.broadcast %19 : vector<64x1xf32> to vector<64x128xf32>
    %22 = vector.broadcast %20 : vector<1x128xf32> to vector<64x128xf32>
    %23 = arith.mulf %21, %22 : vector<64x128xf32>
    %24 = arith.addf %18, %23 : vector<64x128xf32>
    %c0_3 = arith.constant 0 : index
    %c0_4 = arith.constant 0 : index
    %25 = vector.load %arg3[%c0_3, %c0_4] : memref<64x1xf32, #tpu.memory_space<vmem>>, vector<64x1xf32>
    %26 = vector.broadcast %25 : vector<64x1xf32> to vector<64x128xf32>
    %27 = arith.addf %24, %26 : vector<64x128xf32>
    %cst = arith.constant 0.000000e+00 : f32
    %28 = vector.broadcast %cst : f32 to vector<64x128xf32>
    %29 = arith.maximumf %27, %28 : vector<64x128xf32>
    %c0_5 = arith.constant 0 : index
    %c0_6 = arith.constant 0 : index
    %30 = vector.load %arg4[%c0_5, %c0_6] : memref<64x64xf32, #tpu.memory_space<vmem>>, vector<64x64xf32>
    %cst_7 = arith.constant dense<0.000000e+00> : vector<64x128xf32>
    %31 = tpu.matmul %30, %29, %cst_7 {dimension_numbers = #tpu.dot_dimension_numbers<[1], [0], [0], [1], [0, 0, 1, 1], [], []>, precision = #tpu.contract_precision<fp32>} : vector<64x64xf32>, vector<64x128xf32>, vector<64x128xf32> -> vector<64x128xf32>
    %c0_8 = arith.constant 0 : index
    %c0_9 = arith.constant 0 : index
    %32 = vector.load %arg5[%c0_8, %c0_9] : memref<64x1xf32, #tpu.memory_space<vmem>>, vector<64x1xf32>
    %33 = vector.broadcast %32 : vector<64x1xf32> to vector<64x128xf32>
    %34 = arith.addf %31, %33 : vector<64x128xf32>
    %cst_10 = arith.constant 0.000000e+00 : f32
    %35 = vector.broadcast %cst_10 : f32 to vector<64x128xf32>
    %36 = arith.maximumf %34, %35 : vector<64x128xf32>
    %c0_11 = arith.constant 0 : index
    %c0_12 = arith.constant 0 : index
    %37 = vector.load %arg6[%c0_11, %c0_12] : memref<64x64xf32, #tpu.memory_space<vmem>>, vector<64x64xf32>
    %cst_13 = arith.constant dense<0.000000e+00> : vector<64x128xf32>
    %38 = tpu.matmul %37, %36, %cst_13 {dimension_numbers = #tpu.dot_dimension_numbers<[1], [0], [0], [1], [0, 0, 1, 1], [], []>, precision = #tpu.contract_precision<fp32>} : vector<64x64xf32>, vector<64x128xf32>, vector<64x128xf32> -> vector<64x128xf32>
    %c0_14 = arith.constant 0 : index
    %c0_15 = arith.constant 0 : index
    %39 = vector.load %arg7[%c0_14, %c0_15] : memref<64x1xf32, #tpu.memory_space<vmem>>, vector<64x1xf32>
    %40 = vector.broadcast %39 : vector<64x1xf32> to vector<64x128xf32>
    %41 = arith.addf %38, %40 : vector<64x128xf32>
    %cst_16 = arith.constant 0.000000e+00 : f32
    %42 = vector.broadcast %cst_16 : f32 to vector<64x128xf32>
    %43 = arith.maximumf %41, %42 : vector<64x128xf32>
    %c0_17 = arith.constant 0 : index
    %c0_18 = arith.constant 0 : index
    %44 = vector.load %arg8[%c0_17, %c0_18] : memref<64x4xf32, #tpu.memory_space<vmem>>, vector<64x4xf32>
    %c0_19 = arith.constant 0 : index
    %c0_20 = arith.constant 0 : index
    %45 = vector.load %arg9[%c0_19, %c0_20] : memref<4x1xf32, #tpu.memory_space<vmem>>, vector<4x1xf32>
    %46 = vector.extract_strided_slice %44 {offsets = [0, 0], sizes = [64, 1], strides = [1, 1]} : vector<64x4xf32> to vector<64x1xf32>
    %47 = vector.broadcast %46 : vector<64x1xf32> to vector<64x128xf32>
    %48 = arith.mulf %47, %43 : vector<64x128xf32>
    %cst_21 = arith.constant dense<0.000000e+00> : vector<128xf32>
    %49 = vector.multi_reduction <add>, %48, %cst_21 [0] : vector<64x128xf32> to vector<128xf32>
    %50 = vector.shape_cast %49 : vector<128xf32> to vector<1x128xf32>
    %51 = vector.extract_strided_slice %45 {offsets = [0, 0], sizes = [1, 1], strides = [1, 1]} : vector<4x1xf32> to vector<1x1xf32>
    %52 = vector.broadcast %51 : vector<1x1xf32> to vector<1x128xf32>
    %53 = arith.addf %50, %52 : vector<1x128xf32>
    %c0_22 = arith.constant 0 : index
    %c0_23 = arith.constant 0 : index
    %54 = vector.load %arg10[%c0_22, %c0_23] : memref<4x128xf32, #tpu.memory_space<vmem>>, vector<1x128xf32>
    tpu.vector_store %arg10[%c0_22, %c0_23], %53 {strides = array<i32>} : memref<4x128xf32, #tpu.memory_space<vmem>>, vector<1x128xf32>,
    %55 = vector.extract_strided_slice %44 {offsets = [0, 1], sizes = [64, 1], strides = [1, 1]} : vector<64x4xf32> to vector<64x1xf32>
    %56 = vector.broadcast %55 : vector<64x1xf32> to vector<64x128xf32>
    %57 = arith.mulf %56, %43 : vector<64x128xf32>
    %cst_24 = arith.constant dense<0.000000e+00> : vector<128xf32>
    %58 = vector.multi_reduction <add>, %57, %cst_24 [0] : vector<64x128xf32> to vector<128xf32>
    %59 = vector.shape_cast %58 : vector<128xf32> to vector<1x128xf32>
    %60 = vector.extract_strided_slice %45 {offsets = [1, 0], sizes = [1, 1], strides = [1, 1]} : vector<4x1xf32> to vector<1x1xf32>
    %61 = vector.broadcast %60 : vector<1x1xf32> to vector<1x128xf32>
    %62 = arith.addf %59, %61 : vector<1x128xf32>
    %c1 = arith.constant 1 : index
    %c0_25 = arith.constant 0 : index
    %63 = vector.load %arg10[%c1, %c0_25] : memref<4x128xf32, #tpu.memory_space<vmem>>, vector<1x128xf32>
    tpu.vector_store %arg10[%c1, %c0_25], %62 {strides = array<i32>} : memref<4x128xf32, #tpu.memory_space<vmem>>, vector<1x128xf32>,
    %64 = vector.extract_strided_slice %44 {offsets = [0, 2], sizes = [64, 1], strides = [1, 1]} : vector<64x4xf32> to vector<64x1xf32>
    %65 = vector.broadcast %64 : vector<64x1xf32> to vector<64x128xf32>
    %66 = arith.mulf %65, %43 : vector<64x128xf32>
    %cst_26 = arith.constant dense<0.000000e+00> : vector<128xf32>
    %67 = vector.multi_reduction <add>, %66, %cst_26 [0] : vector<64x128xf32> to vector<128xf32>
    %68 = vector.shape_cast %67 : vector<128xf32> to vector<1x128xf32>
    %69 = vector.extract_strided_slice %45 {offsets = [2, 0], sizes = [1, 1], strides = [1, 1]} : vector<4x1xf32> to vector<1x1xf32>
    %70 = vector.broadcast %69 : vector<1x1xf32> to vector<1x128xf32>
    %71 = arith.addf %68, %70 : vector<1x128xf32>
    %c2 = arith.constant 2 : index
    %c0_27 = arith.constant 0 : index
    %72 = vector.load %arg10[%c2, %c0_27] : memref<4x128xf32, #tpu.memory_space<vmem>>, vector<1x128xf32>
    tpu.vector_store %arg10[%c2, %c0_27], %71 {strides = array<i32>} : memref<4x128xf32, #tpu.memory_space<vmem>>, vector<1x128xf32>,
    %73 = vector.extract_strided_slice %44 {offsets = [0, 3], sizes = [64, 1], strides = [1, 1]} : vector<64x4xf32> to vector<64x1xf32>
    %74 = vector.broadcast %73 : vector<64x1xf32> to vector<64x128xf32>
    %75 = arith.mulf %74, %43 : vector<64x128xf32>
    %cst_28 = arith.constant dense<0.000000e+00> : vector<128xf32>
    %76 = vector.multi_reduction <add>, %75, %cst_28 [0] : vector<64x128xf32> to vector<128xf32>
    %77 = vector.shape_cast %76 : vector<128xf32> to vector<1x128xf32>
    %78 = vector.extract_strided_slice %45 {offsets = [3, 0], sizes = [1, 1], strides = [1, 1]} : vector<4x1xf32> to vector<1x1xf32>
    %79 = vector.broadcast %78 : vector<1x1xf32> to vector<1x128xf32>
    %80 = arith.addf %77, %79 : vector<1x128xf32>
    %c3 = arith.constant 3 : index
    %c0_29 = arith.constant 0 : index
    %81 = vector.load %arg10[%c3, %c0_29] : memref<4x128xf32, #tpu.memory_space<vmem>>, vector<1x128xf32>
    tpu.vector_store %arg10[%c3, %c0_29], %80 {strides = array<i32>} : memref<4x128xf32, #tpu.memory_space<vmem>>, vector<1x128xf32>,
    return
  }
  func.func @transform_0(%arg0: i32) -> (i32, i32) {
    %c0_i32 = arith.constant 0 : i32
    %c0_i32_0 = arith.constant 0 : i32
    return %c0_i32, %arg0 : i32, i32
  }
  func.func @transform_1(%arg0: i32) -> (i32, i32) {
    %c0_i32 = arith.constant 0 : i32
    %c0_i32_0 = arith.constant 0 : i32
    %c0_i32_1 = arith.constant 0 : i32
    return %c0_i32, %c0_i32_0 : i32, i32
  }
  func.func @transform_2(%arg0: i32) -> (i32, i32) {
    %c0_i32 = arith.constant 0 : i32
    %c0_i32_0 = arith.constant 0 : i32
    %c0_i32_1 = arith.constant 0 : i32
    return %c0_i32, %c0_i32_0 : i32, i32
  }
  func.func @transform_3(%arg0: i32) -> (i32, i32) {
    %c0_i32 = arith.constant 0 : i32
    %c0_i32_0 = arith.constant 0 : i32
    %c0_i32_1 = arith.constant 0 : i32
    return %c0_i32, %c0_i32_0 : i32, i32
  }
  func.func @transform_4(%arg0: i32) -> (i32, i32) {
    %c0_i32 = arith.constant 0 : i32
    %c0_i32_0 = arith.constant 0 : i32
    %c0_i32_1 = arith.constant 0 : i32
    return %c0_i32, %c0_i32_0 : i32, i32
  }
  func.func @transform_5(%arg0: i32) -> (i32, i32) {
    %c0_i32 = arith.constant 0 : i32
    %c0_i32_0 = arith.constant 0 : i32
    %c0_i32_1 = arith.constant 0 : i32
    return %c0_i32, %c0_i32_0 : i32, i32
  }
  func.func @transform_6(%arg0: i32) -> (i32, i32) {
    %c0_i32 = arith.constant 0 : i32
    %c0_i32_0 = arith.constant 0 : i32
    %c0_i32_1 = arith.constant 0 : i32
    return %c0_i32, %c0_i32_0 : i32, i32
  }
  func.func @transform_7(%arg0: i32) -> (i32, i32) {
    %c0_i32 = arith.constant 0 : i32
    %c0_i32_0 = arith.constant 0 : i32
    %c0_i32_1 = arith.constant 0 : i32
    return %c0_i32, %c0_i32_0 : i32, i32
  }
  func.func @transform_8(%arg0: i32) -> (i32, i32) {
    %c0_i32 = arith.constant 0 : i32
    %c0_i32_0 = arith.constant 0 : i32
    %c0_i32_1 = arith.constant 0 : i32
    return %c0_i32, %c0_i32_0 : i32, i32
  }
  func.func @transform_9(%arg0: i32) -> (i32, i32) {
    %c0_i32 = arith.constant 0 : i32
    %c0_i32_0 = arith.constant 0 : i32
    return %c0_i32, %arg0 : i32, i32
  }
}

</mosaic_0001>

<bundles_post_ra>
// kernel: tpu_custom_call.1
= control target key start
LH: loop header
LB: loop body
LE: loop exit
PB: predicated region body
PF: predicated region fallthrough
CT: control target
= control target key end

     0   :  { %v3024_v2 = vmov 2   ;;  %v3025_v3 = vmov 0   ;;  %v3026_v5 = vmov 1   ;;  %v3027_v7 = vmov 3   ;;  %s4128_s0 = inlined_call_operand.vmem [shape: f32[4,128], index: 0, kind: input, shape index: {}]   ;;  %s4129_s1 = inlined_call_operand.vmem [shape: f32[64,4], index: 1, kind: input, shape index: {}]   ;;  %s4130_s2 = inlined_call_operand.vmem [shape: f32[64,1], index: 2, kind: input, shape index: {}]   ;;  %s4131_s3 = inlined_call_operand.vmem [shape: f32[64,64], index: 3, kind: input, shape index: {}]   ;;  %s4132_s4 = inlined_call_operand.vmem [shape: f32[64,1], index: 4, kind: input, shape index: {}]   ;;  %s4133_s5 = inlined_call_operand.vmem [shape: f32[64,64], index: 5, kind: input, shape index: {}]   ;;  %s4134_s6 = inlined_call_operand.vmem [shape: f32[64,1], index: 6, kind: input, shape index: {}]   ;;  %s4135_s7 = inlined_call_operand.vmem [shape: f32[64,4], index: 7, kind: input, shape index: {}]   ;;  %s4136_s8 = inlined_call_operand.vmem [shape: f32[4,1], index: 8, kind: input, shape index: {}]   ;;  %s4137_s9 = inlined_call_operand.hbm [shape: f32[4,128], index: 9, kind: output, shape index: {}]  }
   0x1   :  { %v40_v0 = vld [vmem:[%s4129_s1 + $0x30] sm:$0xff]  ;;  %v39_v1 = vld [vmem:[%s4129_s1 + $0x28] sm:$0xff]  ;;  %2963 = vset.pattern.permute.xlu0 %v3024_v2  ;;  %2956 = vset.pattern.permute.xlu1 %v3025_v3  ;;  %v37_v4 = vld [vmem:[%s4129_s1 + $0x18] sm:$0xff] }
   0x2   :  { %74 = vperm.xlu1 %2956, %v40_v0   ;;  %167 = vperm.xlu0 %2963, %v39_v1   ;;  %v41_v6 = vld [vmem:[%s4129_s1 + $0x38] sm:$0xff] }
   0x6   :  { %2957 = vset.pattern.permute.xlu1 %v3026_v5  ;;  %159 = vperm.xlu0 %2963, %v37_v4  }
   0x7   :  { %119 = vperm.xlu1 %2957, %v40_v0  }
   0xa   :  { %2970 = vset.pattern.permute.xlu0 %v3027_v7 }
   0xb   :  { %2958 = vset.pattern.permute.xlu1 %v3024_v2  ;;  %227 = vperm.xlu0 %2970, %v41_v6  }
   0xc   :  { %14 = vsyncpa [#allocation3], 0  ;;  %175 = vperm.xlu1 %2958, %v41_v6   ;;  %v38_v8 = vld [vmem:[%s4129_s1 + $0x20] sm:$0xff]  ;;  %v257_v10 = vld [vmem:[%s4130_s2 + $0x38] sm:$0xff]  ;;  %vm370_vm0 = vcmask 523264   ;;  %v82_v56 = vlaneseq }
   0xd   :  { %v3105_v9 = vld [vmem:[%s4129_s1] sm:$0xff]  ;;  %v35_v11 = vld [vmem:[%s4129_s1 + $0x8] sm:$0xff]  ;;  %v253_v13 = vld [vmem:[%s4130_s2 + $0x18] sm:$0xff] }
   0xe   :  { %v254_v12 = vld [vmem:[%s4130_s2 + $0x20] sm:$0xff]  ;;  %v36_v14 = vld [vmem:[%s4129_s1 + $0x10] sm:$0xff]  ;;  %v1250_v22 = vld [vmem:[%s4134_s6 + $0x8] sm:$0xff]  ;;  %v83_v61 = vshrl.u32 %v82_v56, 7 }
   0xf   :  { %211 = vperm.xlu0 %2970, %v37_v4   ;;  %v252_v15 = vld [vmem:[%s4130_s2 + $0x10] sm:$0xff]  ;;  %v250_v16 = vld [vmem:[%s4130_s2] sm:$0xff]  ;;  %v1252_v23 = vld [vmem:[%s4134_s6 + $0x18] sm:$0xff] }
  0x10   :  { %2959 = vset.pattern.permute.xlu1 %v3026_v5  ;;  %v328_v17 = vld [vmem:[%s4132_s4 + $0x30] sm:$0xff]  ;;  %v326_v18 = vld [vmem:[%s4132_s4 + $0x20] sm:$0xff]  ;;  %v255_v24 = vld [vmem:[%s4130_s2 + $0x28] sm:$0xff]  ;;  %v128_v63 = vsub.s32 1, %v83_v61 }
  0x11   :  { %115 = vperm.xlu1 %2959, %v39_v1   ;;  %v256_v19 = vld [vmem:[%s4130_s2 + $0x30] sm:$0xff]  ;;  %v322_v21 = vld [vmem:[%s4132_s4] sm:$0xff]  ;;  %v1254_v25 = vld [vmem:[%s4134_s6 + $0x28] sm:$0xff] }
  0x12   :  { %v324_v20 = vld [vmem:[%s4132_s4 + $0x10] sm:$0xff]  ;;  %v1256_v26 = vld [vmem:[%s4134_s6 + $0x38] sm:$0xff]  ;;  %v3177_v27 = vld [vmem:[%s4135_s7 + $0x8] sm:$0xff] }
  0x13   :  { %2975 = vset.pattern.permute.xlu0 %v3026_v5  ;;  %v3184_v28 = vld [vmem:[%s4135_s7 + $0x18] sm:$0xff]  ;;  %v3191_v29 = vld [vmem:[%s4135_s7 + $0x28] sm:$0xff]  ;;  %v3206_v31 = vld [vmem:[%s4135_s7] sm:$0xff] }
  0x14   :  { %123 = vperm.xlu0 %2975, %v41_v6   ;;  %v3199_v30 = vld [vmem:[%s4135_s7 + $0x38] sm:$0xff]  ;;  %v314_v32 = vld [vmem:[%s4131_s3] sm:$0xff]  ;;  %v251_v35 = vld [vmem:[%s4130_s2 + $0x8] sm:$0xff] }
  0x15   :  { %2960 = vset.pattern.permute.xlu1 %v3024_v2  ;;  %v372_v33 = vsel %vm370_vm0, %v314_v32, 0  ;;  %v3223_v36 = vld [vmem:[%s4135_s7 + $0x10] sm:$0xff]  ;;  %v329_v39 = vld [vmem:[%s4132_s4 + $0x38] sm:$0xff]  ;;  %v327_v44 = vld [vmem:[%s4132_s4 + $0x28] sm:$0xff] }
  0x16   :  { %171 = vperm.xlu1 %2960, %v40_v0   ;;  %v3215_v34 = vand.u32 4294901760, %v372_v33  ;;  %v325_v46 = vld [vmem:[%s4132_s4 + $0x18] sm:$0xff]  ;;  %v3256_v48 = vld [vmem:[%s4135_s7 + $0x20] sm:$0xff]  ;;  %v323_v49 = vld [vmem:[%s4132_s4 + $0x8] sm:$0xff] }
  0x17   :  { %v1249_v52 = vld [vmem:[%s4134_s6] sm:$0xff]  ;;  %v1251_v55 = vld [vmem:[%s4134_s6 + $0x10] sm:$0xff] }
  0x18   :  { %107 = vperm.xlu0 %2975, %v37_v4   ;;  %v3226_v37 = vsub.f32 %v372_v33, %v3215_v34  ;;  %2659 = vmatprep.mubr.f32.mxu1 %v3215_v34  ;;  %v3276_v58 = vld [vmem:[%s4135_s7 + $0x30] sm:$0xff]  ;;  %v1253_v60 = vld [vmem:[%s4134_s6 + $0x20] sm:$0xff] }
  0x1a   :  { %2961 = vset.pattern.permute.xlu1 %v3025_v3  ;;  %v470_v38 = vand.u32 4294901760, %v3226_v37 }
  0x1b   :  { %64 = vperm.xlu1 %2961, %v38_v8  }
  0x1c   :  { %95 = vperm.xlu0 %2975, %v3105_v9   ;;  %v471_v40 = vsub.f32 %v3226_v37, %v470_v38 }
  0x1e   :  { %v472_v41 = vand.u32 4294901760, %v471_v40 }
  0x1f   :  { %2962 = vset.pattern.permute.xlu1 %v3026_v5 }
  0x20   :  { %111 = vperm.xlu1 %2962, %v38_v8   ;;  %2977 = vset.pattern.permute.xlu0 %v3025_v3 }
  0x21   :  { %79 = vperm.xlu0 %2977, %v41_v6   ;;  %2631 = vmatprep.mubr.f32.mxu0 %v472_v41  ;;  %v232_v6 = vsub.s32 3, %v83_v61 }
  0x24   :  { %2964 = vset.pattern.permute.xlu1 %v3027_v7 }
  0x25   :  { %223 = vperm.xlu1 %2964, %v40_v0   ;;  %69 = vperm.xlu0 %2977, %v39_v1   ;;  %v1255_v0 = vld [vmem:[%s4134_s6 + $0x30] sm:$0xff] }
  0x29   :  { %2965 = vset.pattern.permute.xlu1 %v3025_v3  ;;  %295 = vperm.xlu0 %2977, %v257_v10  }
  0x2a   :  { %59 = vperm.xlu1 %2965, %v37_v4   ;;  %v180_v4 = vsub.s32 2, %v83_v61 }
  0x2d   :  { %49 = vperm.xlu0 %2977, %v35_v11  }
  0x2e   :  { %2966 = vset.pattern.permute.xlu1 %v3024_v2 }
  0x2f   :  { %163 = vperm.xlu1 %2966, %v38_v8  }
  0x31   :  { %280 = vperm.xlu0 %2977, %v254_v12  }
  0x33   :  { %2967 = vset.pattern.permute.xlu1 %v3027_v7 }
  0x34   :  { %219 = vperm.xlu1 %2967, %v39_v1  }
  0x35   :  { %275 = vperm.xlu0 %2977, %v253_v13  }
  0x38   :  { %2968 = vset.pattern.permute.xlu1 %v3025_v3 }
  0x39   :  { %54 = vperm.xlu1 %2968, %v36_v14   ;;  %270 = vperm.xlu0 %2977, %v252_v15  }
  0x3d   :  { %2969 = vset.pattern.permute.xlu1 %v3026_v5  ;;  %260 = vperm.xlu0 %2977, %v250_v16  }
  0x3e   :  { %103 = vperm.xlu1 %2969, %v36_v14  }
  0x41   :  { %362 = vperm.xlu0 %2977, %v328_v17  }
  0x42   :  { %2971 = vset.pattern.permute.xlu1 %v3027_v7 }
  0x43   :  { %215 = vperm.xlu1 %2971, %v38_v8  }
  0x45   :  { %352 = vperm.xlu0 %2977, %v326_v18  }
  0x47   :  { %2972 = vset.pattern.permute.xlu1 %v3025_v3 }
  0x48   :  { %290 = vperm.xlu1 %2972, %v256_v19  }
  0x49   :  { %342 = vperm.xlu0 %2977, %v324_v20  }
  0x4c   :  { %2973 = vset.pattern.permute.xlu1 %v3026_v5 }
  0x4d   :  { %99 = vperm.xlu1 %2973, %v35_v11   ;;  %332 = vperm.xlu0 %2977, %v322_v21  }
  0x51   :  { %2974 = vset.pattern.permute.xlu1 %v3024_v2  ;;  %1264 = vperm.xlu0 %2977, %v1250_v22  }
  0x52   :  { %155 = vperm.xlu1 %2974, %v36_v14  }
  0x55   :  { %1274 = vperm.xlu0 %2977, %v1252_v23  }
  0x56   :  { %2976 = vset.pattern.permute.xlu1 %v3025_v3 }
  0x57   :  { %285 = vperm.xlu1 %2976, %v255_v24  }
  0x59   :  { %1284 = vperm.xlu0 %2977, %v1254_v25  }
  0x5b   :  { %44 = vperm.xlu1 %2976, %v3105_v9  }
  0x5d   :  { %1294 = vperm.xlu0 %2977, %v1256_v26  }
  0x5f   :  { %2978 = vset.pattern.permute.xlu1 %v3024_v2 }
  0x60   :  { %151 = vperm.xlu1 %2978, %v35_v11  }
  0x61   :  { %2183 = vperm.xlu0 %2977, %v3177_v27  }
  0x64   :  { %2979 = vset.pattern.permute.xlu1 %v3027_v7 }
  0x65   :  { %2193 = vperm.xlu0 %2977, %v3184_v28   ;;  %207 = vperm.xlu1 %2979, %v36_v14  }
  0x69   :  { %2203 = vperm.xlu0 %2977, %v3191_v29   ;;  %2980 = vset.pattern.permute.xlu1 %v3024_v2 }
  0x6a   :  { %147 = vperm.xlu1 %2980, %v3105_v9  }
  0x6d   :  { %2213 = vperm.xlu0 %2977, %v3199_v30  }
  0x6e   :  { %2981 = vset.pattern.permute.xlu1 %v3027_v7 }
  0x6f   :  { %203 = vperm.xlu1 %2981, %v35_v11  }
  0x71   :  { %2983 = vset.pattern.permute.xlu0 %v3026_v5 }
  0x72   :  { %2245 = vperm.xlu0 %2983, %v3206_v31  }
  0x73   :  { %199 = vperm.xlu1 %2981, %v3105_v9   ;;  %v33_v9 = vld [vmem:[%s4128_s0] sm:$0xf] }
  0x74   :  { %v3296_v10 = vrot.slane %v33_v9, %v128_v63  ;;  %v3301_v12 = vrot.slane %v33_v9, %v180_v4  ;;  %v3303_v13 = vrot.slane %v33_v9, %v232_v6 }
  0x76   :  { %2253 = vperm.xlu0 %2983, %v3223_v36  }
  0x77   :  { %2982 = vset.pattern.permute.xlu1 %v3025_v3  ;;  %v84_v3 = vsub.s32 0, %v83_v61 }
  0x78   :  { %265 = vperm.xlu1 %2982, %v251_v35  }
  0x79   :  { %v3299_v11 = vrot.slane %v33_v9, %v84_v3 }
  0x7a   :  { %2257 = vperm.xlu0 %2983, %v3184_v28  }
  0x7c   :  { %367 = vperm.xlu1 %2982, %v329_v39  }
  0x7d   :  { %v3239_v42 = vpop.permute.xlu1 %74  ;;  %v3241_v43 = vpop.permute.xlu0 %167 }
  0x7e   :  { %2990 = vset.pattern.permute.xlu0 %v3027_v7  ;;  %v92_v63 = vmul.f32 %v3299_v11, %v3239_v42 }
  0x7f   :  { %2367 = vperm.xlu0 %2990, %v3184_v28  }
  0x80   :  { %357 = vperm.xlu1 %2982, %v327_v44  }
  0x81   :  { %v160_v45 = vpop.permute.xlu0 %159 }
  0x82   :  { %v3251_v47 = vpop.permute.xlu1 %119  ;;  %v185_v35 = vmul.f32 %v3301_v12, %v160_v45 }
  0x83   :  { %2371 = vperm.xlu0 %2990, %v3256_v48  }
  0x84   :  { %347 = vperm.xlu1 %2982, %v325_v46  }
  0x86   :  { %v228_v50 = vpop.permute.xlu0 %227 }
  0x87   :  { %v176_v51 = vpop.permute.xlu1 %175  ;;  %2993 = vset.pattern.permute.xlu0 %v3024_v2  ;;  %v241_v19 = vmul.f32 %v3303_v13, %v228_v50 }
  0x88   :  { %337 = vperm.xlu1 %2982, %v323_v49   ;;  %2304 = vperm.xlu0 %2993, %v3177_v27   ;;  %v189_v18 = vmul.f32 %v3301_v12, %v176_v51  ;;  %v2175_v49 = vld [vmem:[%s4136_s8] sm:$0xf] }
  0x8a   :  { %v212_v53 = vpop.permute.xlu0 %211 }
  0x8b   :  { %v237_v41 = vmul.f32 %v3303_v13, %v212_v53 }
  0x8c   :  { %v3267_v54 = vpop.permute.xlu1 %115  ;;  %1259 = vperm.xlu1 %2982, %v1249_v52   ;;  %2320 = vperm.xlu0 %2993, %v3191_v29  }
  0x8f   :  { %v124_v57 = vpop.permute.xlu0 %123 }
  0x90   :  { %1269 = vperm.xlu1 %2982, %v1251_v55   ;;  %2324 = vperm.xlu0 %2993, %v3276_v58   ;;  %v137_v14 = vmul.f32 %v3296_v10, %v124_v57 }
  0x91   :  { %v3279_v59 = vpop.permute.xlu1 %171 }
  0x93   :  { %v108_v62 = vpop.permute.xlu0 %107 }
  0x94   :  { %1279 = vperm.xlu1 %2982, %v1253_v60   ;;  %2998 = vset.pattern.permute.xlu0 %v3026_v5  ;;  %v133_v25 = vmul.f32 %v3296_v10, %v108_v62  ;;  %v136_v62 = vmul.f32 %v3296_v10, %v3251_v47 }
  0x95   :  { %2273 = vperm.xlu0 %2998, %v3199_v30  }
  0x96   :  { %v3289_v1 = vpop.permute.xlu1 %64  ;;  %v144_v6 = vadd.f32 %v136_v62, %v92_v63 }
  0x97   :  { %v3291_v8 = vpop.permute.xlu0 %95  ;;  %v90_v47 = vmul.f32 %v3299_v11, %v3289_v1 }
  0x98   :  { %1289 = vperm.xlu1 %2982, %v1255_v0   ;;  %v188_v0 = vmul.f32 %v3301_v12, %v3279_v59 }
  0x99   :  { %3001 = vset.pattern.permute.xlu0 %v3027_v7 }
  0x9b   :  { %v112_v15 = vpop.permute.xlu1 %111 }
  0x9c   :  { %v80_v16 = vpop.permute.xlu0 %79  ;;  %2178 = vperm.xlu1 %2982, %v3206_v31   ;;  %v134_v4 = vmul.f32 %v3296_v10, %v112_v15 }
  0x9d   :  { %v93_v17 = vmul.f32 %v3299_v11, %v80_v16 }
  0x9e   :  { %v142_v42 = vadd.f32 %v134_v4, %v90_v47 }
  0x9f   :  { %v145_v20 = vadd.f32 %v137_v14, %v93_v17 }
  0xa0   :  { %v224_v21 = vpop.permute.xlu1 %223  ;;  %v70_v22 = vpop.permute.xlu0 %69  ;;  %2188 = vperm.xlu1 %2982, %v3223_v36  }
  0xa1   :  { %v197_v23 = vadd.f32 %v189_v18, %v145_v20  ;;  %v240_v9 = vmul.f32 %v3303_v13, %v224_v21  ;;  %v91_v1 = vmul.f32 %v3299_v11, %v70_v22  ;;  %v187_v22 = vmul.f32 %v3301_v12, %v3241_v43 }
  0xa3   :  { %v249_v24 = vadd.f32 %v241_v19, %v197_v23 }
  0xa4   :  { %v296_v26 = vpop.permute.xlu0 %295  ;;  %2198 = vperm.xlu1 %2982, %v3256_v48  }
  0xa5   :  { %v305_v32 = vadd.f32 %v296_v26, %v249_v24  ;;  %v60_v33 = vpop.permute.xlu1 %59  ;;  %v135_v26 = vmul.f32 %v3296_v10, %v3267_v54 }
  0xa6   :  { %v89_v39 = vmul.f32 %v3299_v11, %v60_v33 }
  0xa7   :  { %v313_v40 = vmax.f32 %v305_v32, 0.0 }
  0xa8   :  { %v141_v44 = vadd.f32 %v133_v25, %v89_v39  ;;  %2208 = vperm.xlu1 %2982, %v3276_v58   ;;  %v3348_v3 = vpop.permute.xlu0 %49 }
  0xa9   :  { %v3317_v46 = vand.u32 4294901760, %v313_v40 }
  0xaa   :  { %v164_v50 = vpop.permute.xlu1 %163  ;;  %v193_v51 = vadd.f32 %v185_v35, %v141_v44  ;;  %v143_v35 = vadd.f32 %v135_v26, %v91_v1 }
  0xab   :  { %v3323_v52 = vsub.f32 %v313_v40, %v3317_v46  ;;  %2615 = vmatprep.subr.mxu0 %v3317_v46  ;;  %v186_v16 = vmul.f32 %v3301_v12, %v164_v50 }
  0xac   :  { %2239 = vperm.xlu1 %2982, %v2175_v49   ;;  %2616 = vmatpush3.msra.mxu0 %v3317_v46  ;;  %v245_v45 = vadd.f32 %v237_v41, %v193_v51  ;;  %v281_v59 = vpop.permute.xlu0 %280  ;;  %v195_v43 = vadd.f32 %v187_v22, %v143_v35 }
  0xad   :  { %v3328_v53 = vand.u32 4294901760, %v3323_v52  ;;  %v194_v19 = vadd.f32 %v186_v16, %v142_v42 }
  0xaf   :  { %v220_v55 = vpop.permute.xlu1 %219  ;;  %v568_v56 = vsub.f32 %v3323_v52, %v3328_v53 }
  0xb0   :  { %2984 = vset.pattern.permute.xlu1 %v3026_v5  ;;  %v276_v24 = vpop.permute.xlu0 %275  ;;  %v239_v54 = vmul.f32 %v3303_v13, %v220_v55 }
  0xb1   :  { %v569_v57 = vand.u32 4294901760, %v568_v56  ;;  %2249 = vperm.xlu1 %2984, %v3177_v27   ;;  %v301_v39 = vadd.f32 %v276_v24, %v245_v45  ;;  %v315_v24 = vld [vmem:[%s4131_s3 + $0x8] sm:$0xff] }
  0xb2   :  { %v247_v45 = vadd.f32 %v239_v54, %v195_v43  ;;  %v87_v43 = vmul.f32 %v3299_v11, %v3348_v3 }
  0xb3   :  { %2643 = vmatprep.subr.mxu1 %v569_v57  ;;  %v309_v49 = vmax.f32 %v301_v39, 0.0  ;;  %v375_v39 = vsel %vm370_vm0, %v315_v24, 0 }
  0xb4   :  { %v3334_v60 = vpop.permute.xlu1 %54  ;;  %2644 = vmatpush3.msra.mxu1 %v569_v57  ;;  %v271_v26 = vpop.permute.xlu0 %270 }
  0xb5   :  { %2985 = vset.pattern.permute.xlu1 %v3024_v2  ;;  %v3386_v55 = vand.u32 4294901760, %v309_v49 }
  0xb6   :  { %2300 = vperm.xlu1 %2985, %v3206_v31  }
  0xb9   :  { %v3338_v61 = vpop.permute.xlu1 %103 }
  0xba   :  { %2986 = vset.pattern.permute.xlu1 %v3027_v7 }
  0xbb   :  { %2355 = vperm.xlu1 %2986, %v3206_v31   ;;  %v196_v31 = vadd.f32 %v188_v0, %v144_v6  ;;  %v3393_v0 = vsub.f32 %v309_v49, %v3386_v55  ;;  %v3449_v49 = vand.u32 4294901760, %v375_v39 }
  0xbd   :  { %v248_v18 = vadd.f32 %v240_v9, %v196_v31  ;;  %v88_v31 = vmul.f32 %v3299_v11, %v3334_v60 }
  0xbe   :  { %v216_v14 = vpop.permute.xlu1 %215 }
  0xbf   :  { %2359 = vperm.xlu1 %2986, %v3177_v27   ;;  %v238_v17 = vmul.f32 %v3303_v13, %v216_v14  ;;  %v132_v14 = vmul.f32 %v3296_v10, %v3338_v61 }
  0xc1   :  { %v246_v21 = vadd.f32 %v238_v17, %v194_v19 }
  0xc3   :  { %v291_v20 = vpop.permute.xlu1 %290  ;;  %2987 = vset.pattern.permute.xlu1 %v3024_v2  ;;  %v302_v32 = vadd.f32 %v281_v59, %v246_v21  ;;  %v140_v59 = vadd.f32 %v132_v14, %v88_v31  ;;  %v319_v14 = vld [vmem:[%s4131_s3 + $0x28] sm:$0xff] }
  0xc4   :  { %v304_v15 = vadd.f32 %v291_v20, %v248_v18  ;;  %2308 = vperm.xlu1 %2987, %v3223_v36  }
  0xc5   :  { %v310_v41 = vmax.f32 %v302_v32, 0.0  ;;  %v316_v32 = vld [vmem:[%s4131_s3 + $0x10] sm:$0xff] }
  0xc6   :  { %v312_v23 = vmax.f32 %v304_v15, 0.0  ;;  %v378_v54 = vsel %vm370_vm0, %v316_v32, 0 }
  0xc7   :  { %v3383_v51 = vand.u32 4294901760, %v310_v41 }
  0xc8   :  { %v3360_v25 = vand.u32 4294901760, %v312_v23  ;;  %v3362_v27 = vpop.permute.xlu1 %99  ;;  %2988 = vset.pattern.permute.xlu1 %v3027_v7 }
  0xc9   :  { %2363 = vperm.xlu1 %2988, %v3223_v36   ;;  %v3390_v62 = vsub.f32 %v310_v41, %v3383_v51  ;;  %v317_v41 = vld [vmem:[%s4131_s3 + $0x18] sm:$0xff] }
  0xca   :  { %v3369_v33 = vsub.f32 %v312_v23, %v3360_v25  ;;  %2617 = vmatprep.subr.mxu0 %v3360_v25 }
  0xcb   :  { %2618 = vmatpush3.msra.mxu0 %v3360_v25  ;;  %v3404_v9 = vand.u32 4294901760, %v3390_v62 }
  0xcc   :  { %v3376_v40 = vand.u32 4294901760, %v3369_v33 }
  0xcd   :  { %v156_v44 = vpop.permute.xlu1 %155  ;;  %2989 = vset.pattern.permute.xlu1 %v3024_v2  ;;  %v589_v17 = vsub.f32 %v3390_v62, %v3404_v9 }
  0xce   :  { %v575_v36 = vsub.f32 %v3369_v33, %v3376_v40  ;;  %2312 = vperm.xlu1 %2989, %v3184_v28   ;;  %v184_v42 = vmul.f32 %v3301_v12, %v156_v44 }
  0xcf   :  { %v590_v21 = vand.u32 4294901760, %v589_v17 }
  0xd0   :  { %v576_v50 = vand.u32 4294901760, %v575_v36  ;;  %v192_v20 = vadd.f32 %v184_v42, %v140_v59 }
  0xd2   :  { %v286_v56 = vpop.permute.xlu1 %285  ;;  %2645 = vmatprep.subr.mxu1 %v576_v50  ;;  %2991 = vset.pattern.permute.xlu1 %v3026_v5 }
  0xd3   :  { %v303_v57 = vadd.f32 %v286_v56, %v247_v45  ;;  %2646 = vmatpush3.msra.mxu1 %v576_v50  ;;  %2261 = vperm.xlu1 %2991, %v3256_v48   ;;  %v3455_v45 = vand.u32 4294901760, %v378_v54  ;;  %v130_v56 = vmul.f32 %v3296_v10, %v3291_v8 }
  0xd5   :  { %v311_v28 = vmax.f32 %v303_v57, 0.0 }
  0xd6   :  { %v45_v63 = vpop.permute.xlu1 %44 }
  0xd7   :  { %v3395_v4 = vand.u32 4294901760, %v311_v28  ;;  %2992 = vset.pattern.permute.xlu1 %v3024_v2  ;;  %v86_v44 = vmul.f32 %v3299_v11, %v45_v63  ;;  %v381_v63 = vsel %vm370_vm0, %v317_v41, 0  ;;  %v318_v11 = vld [vmem:[%s4131_s3 + $0x20] sm:$0xff] }
  0xd8   :  { %2316 = vperm.xlu1 %2992, %v3256_v48   ;;  %v3414_v48 = vand.u32 4294901760, %v3393_v0 }
  0xd9   :  { %v3400_v6 = vsub.f32 %v311_v28, %v3395_v4  ;;  %2619 = vmatprep.subr.mxu0 %v3395_v4  ;;  %v138_v8 = vadd.f32 %v130_v56, %v86_v44 }
  0xda   :  { %2620 = vmatpush3.msra.mxu0 %v3395_v4  ;;  %v596_v18 = vsub.f32 %v3393_v0, %v3414_v48 }
  0xdb   :  { %v152_v47 = vpop.permute.xlu1 %151  ;;  %2621 = vmatprep.subr.mxu0 %v3383_v51  ;;  %v3411_v16 = vand.u32 4294901760, %v3400_v6 }
  0xdc   :  { %2622 = vmatpush3.msra.mxu0 %v3383_v51  ;;  %2994 = vset.pattern.permute.xlu1 %v3026_v5  ;;  %v597_v1 = vand.u32 4294901760, %v596_v18  ;;  %v183_v3 = vmul.f32 %v3301_v12, %v152_v47  ;;  %v384_v47 = vsel %vm370_vm0, %v318_v11, 0 }
  0xdd   :  { %2623 = vmatprep.subr.mxu0 %v3386_v55  ;;  %v582_v61 = vsub.f32 %v3400_v6, %v3411_v16  ;;  %2265 = vperm.xlu1 %2994, %v3191_v29  }
  0xde   :  { %2624 = vmatpush3.msra.mxu0 %v3386_v55 }
  0xdf   :  { %v583_v60 = vand.u32 4294901760, %v582_v61 }
  0xe0   :  { %v208_v19 = vpop.permute.xlu1 %207 }
  0xe1   :  { %v236_v15 = vmul.f32 %v3303_v13, %v208_v19  ;;  %2647 = vmatprep.subr.mxu1 %v583_v60  ;;  %2995 = vset.pattern.permute.xlu1 %v3027_v7  ;;  %v387_v19 = vsel %vm370_vm0, %v319_v14, 0 }
  0xe2   :  { %2648 = vmatpush3.msra.mxu1 %v583_v60  ;;  %2375 = vperm.xlu1 %2995, %v3191_v29   ;;  %v3489_v60 = vsub.f32 %v378_v54, %v3455_v45 }
  0xe3   :  { %v244_v23 = vadd.f32 %v236_v15, %v192_v20  ;;  %2649 = vmatprep.subr.mxu1 %v590_v21 }
  0xe4   :  { %2650 = vmatpush3.msra.mxu1 %v590_v21  ;;  %v3493_v21 = vand.u32 4294901760, %v384_v47 }
  0xe5   :  { %v300_v22 = vadd.f32 %v271_v26, %v244_v23  ;;  %v148_v35 = vpop.permute.xlu1 %147  ;;  %2651 = vmatprep.subr.mxu1 %v597_v1  ;;  %v320_v23 = vld [vmem:[%s4131_s3 + $0x30] sm:$0xff] }
  0xe6   :  { %2652 = vmatpush3.msra.mxu1 %v597_v1  ;;  %2996 = vset.pattern.permute.xlu1 %v3026_v5  ;;  %v131_v5 = vmul.f32 %v3296_v10, %v3362_v27  ;;  %v182_v28 = vmul.f32 %v3301_v12, %v148_v35  ;;  %v3476_v27 = vsub.f32 %v375_v39, %v3449_v49  ;;  %v3482_v12 = vand.u32 4294901760, %v381_v63  ;;  %v321_v39 = vld [vmem:[%s4131_s3 + $0x38] sm:$0xff] }
  0xe7   :  { %v308_v29 = vmax.f32 %v300_v22, 0.0  ;;  %2269 = vperm.xlu1 %2996, %v3276_v58   ;;  %v3504_v35 = vand.u32 4294901760, %v387_v19  ;;  %v390_v54 = vsel %vm370_vm0, %v320_v23, 0  ;;  %v3511_v44 = vsub.f32 %v384_v47, %v3493_v21 }
  0xe8   :  { %v139_v31 = vadd.f32 %v131_v5, %v87_v43  ;;  %v480_v24 = vand.u32 4294901760, %v3476_v27  ;;  %v3501_v26 = vsub.f32 %v381_v63, %v3482_v12  ;;  %v393_v56 = vsel %vm370_vm0, %v321_v39, 0 }
  0xe9   :  { %v3447_v36 = vand.u32 4294901760, %v308_v29  ;;  %v3526_v11 = vsub.f32 %v387_v19, %v3504_v35  ;;  %v510_v14 = vand.u32 4294901760, %v3511_v44 }
  0xea   :  { %v204_v50 = vpop.permute.xlu1 %203  ;;  %v191_v18 = vadd.f32 %v183_v3, %v139_v31  ;;  %v481_v5 = vsub.f32 %v3476_v27, %v480_v24  ;;  %v3536_v31 = vand.u32 4294901760, %v393_v56 }
  0xeb   :  { %v3460_v57 = vsub.f32 %v308_v29, %v3447_v36  ;;  %2625 = vmatprep.subr.mxu0 %v3447_v36  ;;  %2997 = vset.pattern.permute.xlu1 %v3027_v7  ;;  %v235_v42 = vmul.f32 %v3303_v13, %v204_v50  ;;  %v500_v50 = vand.u32 4294901760, %v3501_v26  ;;  %v511_v19 = vsub.f32 %v3511_v44, %v510_v14 }
  0xec   :  { %2626 = vmatpush3.msra.mxu0 %v3447_v36  ;;  %2379 = vperm.xlu1 %2997, %v3276_v58   ;;  %v190_v58 = vadd.f32 %v182_v28, %v138_v8 }
  0xed   :  { %v3473_v10 = vand.u32 4294901760, %v3460_v57  ;;  %v243_v1 = vadd.f32 %v235_v42, %v191_v18  ;;  %v482_v42 = vand.u32 4294901760, %v481_v5  ;;  %v512_v39 = vand.u32 4294901760, %v511_v19 }
  0xee   :  { %v200_v61 = vpop.permute.xlu1 %199 }
  0xef   :  { %v234_v17 = vmul.f32 %v3303_v13, %v200_v61  ;;  %v603_v59 = vsub.f32 %v3460_v57, %v3473_v10  ;;  %v261_v13 = vpop.permute.xlu0 %260  ;;  %v501_v61 = vsub.f32 %v3501_v26, %v500_v50 }
  0xf0   :  { %2999 = vset.pattern.permute.xlu1 %v3024_v2  ;;  %v490_v2 = vand.u32 4294901760, %v3489_v60 }
  0xf1   :  { %v242_v20 = vadd.f32 %v234_v17, %v190_v58  ;;  %v604_v15 = vand.u32 4294901760, %v603_v59  ;;  %2328 = vperm.xlu1 %2999, %v3199_v30   ;;  %v520_v17 = vand.u32 4294901760, %v3526_v11 }
  0xf2   :  { %v491_v63 = vsub.f32 %v3489_v60, %v490_v2 }
  0xf3   :  { %v298_v32 = vadd.f32 %v261_v13, %v242_v20  ;;  %v266_v22 = vpop.permute.xlu1 %265  ;;  %2653 = vmatprep.subr.mxu1 %v604_v15  ;;  %v3559_v20 = vsub.f32 %v393_v56, %v3536_v31 }
  0xf4   :  { %v299_v29 = vadd.f32 %v266_v22, %v243_v1  ;;  %2654 = vmatpush3.msra.mxu1 %v604_v15  ;;  %v492_v47 = vand.u32 4294901760, %v491_v63  ;;  %v502_v15 = vand.u32 4294901760, %v501_v61  ;;  %v521_v1 = vsub.f32 %v3526_v11, %v520_v17 }
  0xf5   :  { %v306_v41 = vmax.f32 %v298_v32, 0.0  ;;  %3000 = vset.pattern.permute.xlu1 %v3027_v7  ;;  %v3528_v7 = vand.u32 4294901760, %v390_v54 }
  0xf6   :  { %v307_v43 = vmax.f32 %v299_v29, 0.0  ;;  %2383 = vperm.xlu1 %3000, %v3199_v30   ;;  %v540_v29 = vand.u32 4294901760, %v3559_v20 }
  0xf7   :  { %v3520_v28 = vand.u32 4294901760, %v306_v41  ;;  %v3549_v59 = vsub.f32 %v390_v54, %v3528_v7  ;;  %v368_v56 = vpop.permute.xlu1 %367 }
  0xf8   :  { %v3530_v3 = vand.u32 4294901760, %v307_v43 }
  0xf9   :  { %v3533_v8 = vsub.f32 %v306_v41, %v3520_v28  ;;  %v530_v32 = vand.u32 4294901760, %v3549_v59 }
  0xfa   :  { %v608_v30 = vsub.f32 %v307_v43, %v3530_v3  ;;  %2627 = vmatprep.subr.mxu0 %v3530_v3 }
  0xfb   :  { %2628 = vmatpush3.msra.mxu0 %v3530_v3  ;;  %v3545_v58 = vand.u32 4294901760, %v3533_v8  ;;  %v531_v41 = vsub.f32 %v3549_v59, %v530_v32 }
  0xfc   :  { %2629 = vmatprep.subr.mxu0 %v3520_v28  ;;  %v3552_v18 = vand.u32 4294901760, %v608_v30 }
  0xfd   :  { %2630 = vmatpush3.msra.mxu0 %v3520_v28  ;;  %v617_v13 = vsub.f32 %v3533_v8, %v3545_v58  ;;  %v532_v43 = vand.u32 4294901760, %v531_v41 }
  0xfe   :  { %2632 = vmatmul.mubr.f32.vlgmr.msra.gmra.mxu0 %v482_v42  ;;  %2671 = vmatprep.subr.mxu0 %v3323_v52  ;;  %v610_v23 = vsub.f32 %v608_v30, %v3552_v18 }
  0xff   :  { %2672 = vmatpush3.msra.mxu0 %v3323_v52  ;;  %2634 = vmatprep.mubr.f32.mxu0 %v492_v47  ;;  %v618_v54 = vand.u32 4294901760, %v617_v13  ;;  %v522_v52 = vand.u32 4294901760, %v521_v1 }
 0x100   :  { %2673 = vmatprep.subr.mxu0 %v3369_v33  ;;  %v611_v22 = vand.u32 4294901760, %v610_v23 }
 0x101   :  { %2674 = vmatpush3.msra.mxu0 %v3369_v33  ;;  %v541_v33 = vsub.f32 %v3559_v20, %v540_v29 }
 0x102   :  { %2635 = vmatmul.mubr.f32.gmra.mxu0 %v502_v15  ;;  %2655 = vmatprep.subr.mxu1 %v611_v22 }
 0x103   :  { %2675 = vmatprep.subr.mxu0 %v3400_v6  ;;  %2656 = vmatpush3.msra.mxu1 %v611_v22 }
 0x104   :  { %2676 = vmatpush3.msra.mxu0 %v3400_v6  ;;  %2657 = vmatprep.subr.mxu1 %v618_v54  ;;  %v542_v6 = vand.u32 4294901760, %v541_v33 }
 0x105   :  { %2677 = vmatprep.subr.mxu0 %v3390_v62  ;;  %2637 = vmatprep.mubr.f32.mxu0 %v512_v39 }
 0x106   :  { %2658 = vmatpush3.msra.mxu1 %v618_v54  ;;  %2678 = vmatpush3.msra.mxu0 %v3390_v62 }
 0x107   :  { %2638 = vmatmul.mubr.f32.gmra.mxu0 %v522_v52  ;;  %2660 = vmatmul.mubr.f32.vlgmr.msra.gmra.mxu1 %v3449_v49 }
 0x108   :  { %2679 = vmatprep.subr.mxu0 %v3393_v0  ;;  %2699 = vmatprep.subr.mxu1 %v3317_v46 }
 0x109   :  { %2680 = vmatpush3.msra.mxu0 %v3393_v0  ;;  %2700 = vmatpush3.msra.mxu1 %v3317_v46 }
 0x10a   :  { %2681 = vmatprep.subr.mxu0 %v3460_v57  ;;  %2701 = vmatprep.subr.mxu1 %v3360_v25 }
 0x10b   :  { %2640 = vmatprep.mubr.f32.mxu0 %v532_v43  ;;  %2662 = vmatprep.mubr.f32.mxu1 %v3455_v45 }
 0x10c   :  { %2682 = vmatpush3.msra.mxu0 %v3460_v57  ;;  %2702 = vmatpush3.msra.mxu1 %v3360_v25 }
 0x10d   :  { %2641 = vmatmul.mubr.f32.gmra.mxu0 %v542_v6  ;;  %2663 = vmatmul.mubr.f32.gmra.mxu1 %v3482_v12 }
 0x10e   :  { %2683 = vmatprep.subr.mxu0 %v608_v30  ;;  %2703 = vmatprep.subr.mxu1 %v3395_v4 }
 0x10f   :  { %2684 = vmatpush3.msra.mxu0 %v608_v30  ;;  %2704 = vmatpush3.msra.mxu1 %v3395_v4 }
 0x110   :  { %2685 = vmatprep.subr.mxu0 %v3533_v8  ;;  %2705 = vmatprep.subr.mxu1 %v3383_v51 }
 0x111   :  { %2665 = vmatprep.mubr.f32.mxu1 %v3493_v21  ;;  %2686 = vmatpush3.msra.mxu0 %v3533_v8  ;;  %v358_v8 = vpop.permute.xlu1 %357 }
 0x112   :  { %2687 = vmatprep.mubr.f32.mxu0 %v3226_v37  ;;  %2706 = vmatpush3.msra.mxu1 %v3383_v51 }
 0x113   :  { %2666 = vmatmul.mubr.f32.gmra.mxu1 %v3504_v35  ;;  %2688 = vmatmul.mubr.f32.vlgmr.msra.gmra.mxu0 %v3476_v27 }
 0x114   :  { %2707 = vmatprep.subr.mxu1 %v3386_v55  ;;  %2727 = vmatprep.subr.mxu0 %v3328_v53 }
 0x115   :  { %2708 = vmatpush3.msra.mxu1 %v3386_v55  ;;  %2728 = vmatpush3.msra.mxu0 %v3328_v53 }
 0x116   :  { %2709 = vmatprep.subr.mxu1 %v3447_v36  ;;  %2729 = vmatprep.subr.mxu0 %v3376_v40 }
 0x117   :  { %2668 = vmatprep.mubr.f32.mxu1 %v3528_v7  ;;  %2690 = vmatprep.mubr.f32.mxu0 %v3489_v60 }
 0x118   :  { %2710 = vmatpush3.msra.mxu1 %v3447_v36  ;;  %2730 = vmatpush3.msra.mxu0 %v3376_v40 }
 0x119   :  { %2669 = vmatmul.mubr.f32.gmra.mxu1 %v3536_v31  ;;  %2691 = vmatmul.mubr.f32.gmra.mxu0 %v3501_v26 }
 0x11a   :  { %2711 = vmatprep.subr.mxu1 %v3530_v3  ;;  %2731 = vmatprep.subr.mxu0 %v3411_v16 }
 0x11b   :  { %2712 = vmatpush3.msra.mxu1 %v3530_v3  ;;  %2732 = vmatpush3.msra.mxu0 %v3411_v16 }
 0x11c   :  { %2713 = vmatprep.subr.mxu1 %v3520_v28  ;;  %2733 = vmatprep.subr.mxu0 %v3404_v9 }
 0x11d   :  { %2693 = vmatprep.mubr.f32.mxu0 %v3511_v44  ;;  %2714 = vmatpush3.msra.mxu1 %v3520_v28 }
 0x11e   :  { %2715 = vmatprep.mubr.f32.mxu1 %v470_v38  ;;  %2734 = vmatpush3.msra.mxu0 %v3404_v9 }
 0x11f   :  { %2694 = vmatmul.mubr.f32.gmra.mxu0 %v3526_v11  ;;  %2716 = vmatmul.mubr.f32.vlgmr.msra.gmra.mxu1 %v480_v24  ;;  %v363_v11 = vpop.permute.xlu0 %362 }
 0x120   :  { %2735 = vmatprep.subr.mxu0 %v3414_v48  ;;  %2755 = vmatprep.subr.mxu1 %v3317_v46 }
 0x121   :  { %2736 = vmatpush3.msra.mxu0 %v3414_v48  ;;  %2756 = vmatpush3.msra.mxu1 %v3317_v46 }
 0x122   :  { %2737 = vmatprep.subr.mxu0 %v3473_v10  ;;  %2757 = vmatprep.subr.mxu1 %v3360_v25 }
 0x123   :  { %2696 = vmatprep.mubr.f32.mxu0 %v3549_v59  ;;  %2718 = vmatprep.mubr.f32.mxu1 %v490_v2  ;;  %v353_v30 = vpop.permute.xlu0 %352 }
 0x124   :  { %2738 = vmatpush3.msra.mxu0 %v3473_v10  ;;  %2758 = vmatpush3.msra.mxu1 %v3360_v25 }
 0x125   :  { %2697 = vmatmul.mubr.f32.gmra.mxu0 %v3559_v20  ;;  %2719 = vmatmul.mubr.f32.gmra.mxu1 %v500_v50 }
 0x126   :  { %2739 = vmatprep.subr.mxu0 %v3552_v18  ;;  %2759 = vmatprep.subr.mxu1 %v3395_v4 }
 0x127   :  { %2740 = vmatpush3.msra.mxu0 %v3552_v18  ;;  %2760 = vmatpush3.msra.mxu1 %v3395_v4  ;;  %v343_v19 = vpop.permute.xlu0 %342 }
 0x128   :  { %2741 = vmatprep.subr.mxu0 %v3545_v58  ;;  %2761 = vmatprep.subr.mxu1 %v3383_v51 }
 0x129   :  { %2721 = vmatprep.mubr.f32.mxu1 %v510_v14  ;;  %2742 = vmatpush3.msra.mxu0 %v3545_v58 }
 0x12a   :  { %2743 = vmatprep.mubr.f32.mxu0 %v3215_v34  ;;  %2762 = vmatpush3.msra.mxu1 %v3383_v51 }
 0x12b   :  { %2722 = vmatmul.mubr.f32.gmra.mxu1 %v520_v17  ;;  %2744 = vmatmul.mubr.f32.vlgmr.msra.gmra.mxu0 %v3449_v49  ;;  %v348_v17 = vpop.permute.xlu1 %347 }
 0x12c   :  { %2763 = vmatprep.subr.mxu1 %v3386_v55  ;;  %2724 = vmatprep.mubr.f32.mxu1 %v530_v32 }
 0x12d   :  { %2764 = vmatpush3.msra.mxu1 %v3386_v55  ;;  %2746 = vmatprep.mubr.f32.mxu0 %v3455_v45 }
 0x12e   :  { %2765 = vmatprep.subr.mxu1 %v3447_v36 }
 0x12f   :  { %2766 = vmatpush3.msra.mxu1 %v3447_v36  ;;  %2747 = vmatmul.mubr.f32.gmra.mxu0 %v3482_v12  ;;  %v338_v41 = vpop.permute.xlu1 %337 }
 0x130   :  { %2725 = vmatmul.mubr.f32.gmra.mxu1 %v540_v29  ;;  %2767 = vmatprep.subr.mxu1 %v3530_v3 }
 0x131   :  { %2768 = vmatpush3.msra.mxu1 %v3530_v3  ;;  %2749 = vmatprep.mubr.f32.mxu0 %v3493_v21 }
 0x132   :  { %2769 = vmatprep.subr.mxu1 %v3520_v28  ;;  %2771 = vmatprep.mubr.f32.mxu1 %v3215_v34  ;;  %v1241_v34 = vld [vmem:[%s4133_s5] sm:$0xff] }
 0x133   :  { %2770 = vmatpush3.msra.mxu1 %v3520_v28  ;;  %2750 = vmatmul.mubr.f32.gmra.mxu0 %v3504_v35  ;;  %v1298_v37 = vsel %vm370_vm0, %v1241_v34, 0 }
 0x134   :  { %2772 = vmatmul.mubr.f32.vlgmr.msra.gmra.mxu1 %v3449_v49  ;;  %2752 = vmatprep.mubr.f32.mxu0 %v3528_v7  ;;  %v3688_v38 = vand.u32 4294901760, %v1298_v37 }
 0x135   :  { %2774 = vmatprep.mubr.f32.mxu1 %v3455_v45 }
 0x136   :  { %v3691_v46 = vsub.f32 %v1298_v37, %v3688_v38 }
 0x137   :  { %2753 = vmatmul.mubr.f32.gmra.mxu0 %v3536_v31 }
 0x138   :  { %2775 = vmatmul.mubr.f32.gmra.mxu1 %v3482_v12  ;;  %v1396_v53 = vand.u32 4294901760, %v3691_v46 }
 0x139   :  { %2777 = vmatprep.mubr.f32.mxu1 %v3493_v21 }
 0x13a   :  { %v1397_v25 = vsub.f32 %v3691_v46, %v1396_v53 }
 0x13c   :  { %2778 = vmatmul.mubr.f32.gmra.mxu1 %v3504_v35  ;;  %v1398_v40 = vand.u32 4294901760, %v1397_v25 }
 0x13d   :  { %2780 = vmatprep.mubr.f32.mxu1 %v3528_v7 }
 0x13e   :  { %2799 = vmatprep.mubr.f32.mxu0 %v1398_v40 }
 0x140   :  { %2781 = vmatmul.mubr.f32.gmra.mxu1 %v3536_v31 }
 0x141   :  { %2827 = vmatprep.mubr.f32.mxu1 %v3688_v38 }
 0x1be   :  { %v2633_v51 = vpop.f32.mrf.mxu0 }
 0x1bf   :  { %v485_v37 = vadd.f32 %v2633_v51, %v338_v41 }
 0x1c0   :  { %v3698_v55 = vpop.f32.mrf.mxu0 }
 0x1c2   :  { %v2636_v62 = vpop.f32.mrf.mxu0 }
 0x1c3   :  { %v505_v20 = vadd.f32 %v2636_v62, %v348_v17 }
 0x1c4   :  { %v494_v0 = vpop.f32.mrf.mxu0 }
 0x1c5   :  { %v495_v1 = vadd.f32 %v494_v0, %v343_v19 }
 0x1c7   :  { %v2639_v4 = vpop.f32.mrf.mxu0  ;;  %v3700_v9 = vpop.f32.mrf.mxu1 }
 0x1c8   :  { %v525_v15 = vadd.f32 %v2639_v4, %v358_v8  ;;  %v333_v4 = vpop.permute.xlu0 %332 }
 0x1c9   :  { %v514_v16 = vpop.f32.mrf.mxu0  ;;  %v3702_v48 = vpop.f32.mrf.mxu1 }
 0x1ca   :  { %v515_v32 = vadd.f32 %v514_v16, %v353_v30 }
 0x1cd   :  { %v2642_v36 = vpop.f32.mrf.mxu0  ;;  %v2664_v49 = vpop.f32.mrf.mxu1 }
 0x1ce   :  { %v674_v22 = vadd.f32 %v2664_v49, %v505_v20  ;;  %v545_v54 = vadd.f32 %v2642_v36, %v368_v56  ;;  %v662_v36 = vadd.f32 %v3700_v9, %v485_v37  ;;  %v1245_v37 = vld [vmem:[%s4133_s5 + $0x20] sm:$0xff] }
 0x1cf   :  { %v534_v45 = vpop.f32.mrf.mxu0  ;;  %v667_v57 = vpop.f32.mrf.mxu1 }
 0x1d0   :  { %v668_v33 = vadd.f32 %v667_v57, %v495_v1  ;;  %v535_v25 = vadd.f32 %v534_v45, %v363_v11  ;;  %v1242_v45 = vld [vmem:[%s4133_s5 + $0x8] sm:$0xff] }
 0x1d1   :  { %v1301_v20 = vsel %vm370_vm0, %v1242_v45, 0 }
 0x1d3   :  { %v2667_v10 = vpop.f32.mrf.mxu1  ;;  %v3704_v27 = vpop.f32.mrf.mxu0 }
 0x1d4   :  { %v686_v39 = vadd.f32 %v2667_v10, %v525_v15  ;;  %v475_v10 = vadd.f32 %v3698_v55, %v333_v4 }
 0x1d5   :  { %v679_v12 = vpop.f32.mrf.mxu1  ;;  %v3706_v60 = vpop.f32.mrf.mxu0 }
 0x1d6   :  { %v680_v43 = vadd.f32 %v679_v12, %v515_v32 }
 0x1d9   :  { %v2670_v21 = vpop.f32.mrf.mxu1  ;;  %v2692_v24 = vpop.f32.mrf.mxu0 }
 0x1da   :  { %v807_v6 = vadd.f32 %v2692_v24, %v674_v22  ;;  %v698_v40 = vadd.f32 %v2670_v21, %v545_v54  ;;  %v656_v21 = vadd.f32 %v3702_v48, %v475_v10 }
 0x1db   :  { %v691_v26 = vpop.f32.mrf.mxu1  ;;  %v799_v2 = vpop.f32.mrf.mxu0 }
 0x1dc   :  { %v800_v8 = vadd.f32 %v799_v2, %v668_v33  ;;  %v692_v56 = vadd.f32 %v691_v26, %v535_v25  ;;  %v793_v2 = vadd.f32 %v3704_v27, %v662_v36  ;;  %v3742_v33 = vand.u32 4294901760, %v1301_v20 }
 0x1df   :  { %v2695_v35 = vpop.f32.mrf.mxu0  ;;  %v3708_v44 = vpop.f32.mrf.mxu1 }
 0x1e0   :  { %v821_v34 = vadd.f32 %v2695_v35, %v686_v39  ;;  %v1244_v39 = vld [vmem:[%s4133_s5 + $0x18] sm:$0xff] }
 0x1e1   :  { %v813_v5 = vpop.f32.mrf.mxu0  ;;  %v3710_v50 = vpop.f32.mrf.mxu1 }
 0x1e2   :  { %v814_v17 = vadd.f32 %v813_v5, %v680_v43 }
 0x1e5   :  { %v2698_v28 = vpop.f32.mrf.mxu0  ;;  %v2720_v63 = vpop.f32.mrf.mxu1 }
 0x1e6   :  { %v940_v0 = vadd.f32 %v2720_v63, %v807_v6  ;;  %v835_v30 = vadd.f32 %v2698_v28, %v698_v40 }
 0x1e7   :  { %v827_v7 = vpop.f32.mrf.mxu0  ;;  %v931_v3 = vpop.f32.mrf.mxu1 }
 0x1e8   :  { %v932_v12 = vadd.f32 %v931_v3, %v800_v8  ;;  %v828_v5 = vadd.f32 %v827_v7, %v692_v56  ;;  %v786_v3 = vadd.f32 %v3706_v60, %v656_v21  ;;  %v1243_v7 = vld [vmem:[%s4133_s5 + $0x10] sm:$0xff]  ;;  %v1246_v8 = vld [vmem:[%s4133_s5 + $0x28] sm:$0xff] }
 0x1eb   :  { %v2723_v14 = vpop.f32.mrf.mxu1  ;;  %v3712_v31 = vpop.f32.mrf.mxu0 }
 0x1ec   :  { %v956_v16 = vadd.f32 %v2723_v14, %v821_v34 }
 0x1ed   :  { %v947_v42 = vpop.f32.mrf.mxu1  ;;  %v3714_v61 = vpop.f32.mrf.mxu0 }
 0x1ee   :  { %v948_v24 = vadd.f32 %v947_v42, %v814_v17  ;;  %v924_v42 = vadd.f32 %v3708_v44, %v793_v2 }
 0x1ef   :  { %v2748_v47 = vpop.f32.mrf.mxu0 }
 0x1f0   :  { %v2726_v58 = vpop.f32.mrf.mxu1  ;;  %v1085_v35 = vadd.f32 %v2748_v47, %v940_v0  ;;  %v3763_v0 = vsub.f32 %v1301_v20, %v3742_v33 }
 0x1f1   :  { %v1078_v59 = vpop.f32.mrf.mxu0  ;;  %v972_v63 = vadd.f32 %v2726_v58, %v835_v30  ;;  %v916_v58 = vadd.f32 %v3710_v50, %v786_v3  ;;  %v1304_v50 = vsel %vm370_vm0, %v1243_v7, 0 }
 0x1f2   :  { %v963_v18 = vpop.f32.mrf.mxu1  ;;  %v1079_v11 = vadd.f32 %v1078_v59, %v932_v12  ;;  %v1073_v59 = vadd.f32 %v3712_v31, %v924_v42  ;;  %v1313_v12 = vsel %vm370_vm0, %v1246_v8, 0  ;;  %v1406_v2 = vand.u32 4294901760, %v3763_v0 }
 0x1f3   :  { %v2751_v23 = vpop.f32.mrf.mxu0  ;;  %v964_v47 = vadd.f32 %v963_v18, %v828_v5  ;;  %v3826_v42 = vand.u32 4294901760, %v1313_v12 }
 0x1f4   :  { %v3716_v13 = vpop.f32.mrf.mxu1  ;;  %v1097_v51 = vadd.f32 %v2751_v23, %v956_v16  ;;  %v3765_v16 = vand.u32 4294901760, %v1304_v50 }
 0x1f5   :  { %v1090_v29 = vpop.f32.mrf.mxu0  ;;  %v1194_v54 = vadd.f32 %v3716_v13, %v1073_v59 }
 0x1f6   :  { %v3718_v52 = vpop.f32.mrf.mxu1  ;;  %v1091_v9 = vadd.f32 %v1090_v29, %v948_v24  ;;  %v1067_v29 = vadd.f32 %v3714_v61, %v916_v58  ;;  %v1307_v61 = vsel %vm370_vm0, %v1244_v39, 0  ;;  %v3801_v5 = vsub.f32 %v1304_v50, %v3765_v16 }
 0x1f7   :  { %v2754_v49 = vpop.f32.mrf.mxu0  ;;  %v1234_v17 = vmax.f32 %v1194_v54, 0.0 }
 0x1f8   :  { %v2776_v62 = vpop.f32.mrf.mxu1  ;;  %v1109_v15 = vadd.f32 %v2754_v49, %v972_v63  ;;  %v1188_v25 = vadd.f32 %v3718_v52, %v1067_v29  ;;  %v1310_v52 = vsel %vm370_vm0, %v1245_v37, 0  ;;  %v1416_v7 = vand.u32 4294901760, %v3801_v5 }
 0x1f9   :  { %v1206_v26 = vadd.f32 %v2776_v62, %v1085_v35  ;;  %v1102_v28 = vpop.f32.mrf.mxu0  ;;  %v3796_v21 = vand.u32 4294901760, %v1234_v17  ;;  %v3803_v63 = vand.u32 4294901760, %v1310_v52 }
 0x1fa   :  { %v1199_v57 = vpop.f32.mrf.mxu1  ;;  %v1103_v1 = vadd.f32 %v1102_v28, %v964_v47  ;;  %v1233_v30 = vmax.f32 %v1188_v25, 0.0  ;;  %v1247_v28 = vld [vmem:[%s4133_s5 + $0x30] sm:$0xff] }
 0x1fb   :  { %v1200_v48 = vadd.f32 %v1199_v57, %v1079_v11  ;;  %v1236_v32 = vmax.f32 %v1206_v26, 0.0  ;;  %v3780_v57 = vand.u32 4294901760, %v1307_v61  ;;  %v1316_v58 = vsel %vm370_vm0, %v1247_v28, 0 }
 0x1fc   :  { %v2779_v55 = vpop.f32.mrf.mxu1  ;;  %v3869_v50 = vand.u32 4294901760, %v1316_v58 }
 0x1fd   :  { %v1218_v14 = vadd.f32 %v2779_v55, %v1097_v51  ;;  %v1235_v31 = vmax.f32 %v1200_v48, 0.0  ;;  %v3752_v40 = vand.u32 4294901760, %v1236_v32  ;;  %v3824_v3 = vsub.f32 %v1307_v61, %v3780_v57  ;;  %v1248_v48 = vld [vmem:[%s4133_s5 + $0x38] sm:$0xff]  ;;  %s3028_s5 = smov [#allocation2]  }
 0x1fe   :  { %v1211_v19 = vpop.f32.mrf.mxu1  ;;  %v1319_v39 = vsel %vm370_vm0, %v1248_v48, 0  ;;  %s2415_s24 = sshll.u32 %s3028_s5, 4  ;;  %s2416_s24 = int_to_ptr.vmem [resolvable:$true] %s2415_s24 }
 0x1ff   :  { %v1238_v23 = vmax.f32 %v1218_v14, 0.0  ;;  %v1212_v27 = vadd.f32 %v1211_v19, %v1091_v9  ;;  %v3768_v49 = vand.u32 4294901760, %v1235_v31  ;;  %v3784_v24 = vsub.f32 %v1236_v32, %v3752_v40  ;;  %s3002_s25 = scalar_lea.vmem %s2416_s24, 64  ;;  %p3007_p1 = scmp.lt.s32.totalorder %s2416_s24, %s2416_s24 }
 0x200   :  { %v2782_v60 = vpop.f32.mrf.mxu1  ;;  %v3820_v14 = vand.u32 4294901760, %v1233_v30  ;;  %v3855_v32 = vsub.f32 %v1310_v52, %v3803_v63  ;;  %p3003_p0 = scmp.ne.s32.totalorder %s2416_s24, %s3002_s25  ;;  %p3008_p2 = scmp.lt.s32.totalorder %s3002_s25, %s3002_s25 }
 0x201   :  { %v3735_v44 = vand.u32 4294901760, %v1238_v23  ;;  %v1237_v18 = vmax.f32 %v1212_v27, 0.0  ;;  %v1230_v22 = vadd.f32 %v2782_v60, %v1109_v15  ;;  %v3806_v55 = vsub.f32 %v1235_v31, %v3768_v49 }
 0x202   :  { %v1223_v41 = vpop.f32.mrf.mxu1  ;;  %v3834_v15 = vand.u32 4294901760, %v3784_v24  ;;  %v1407_v27 = vsub.f32 %v3763_v0, %v1406_v2  ;;  %v1436_v61 = vand.u32 4294901760, %v3855_v32  ;;  %p3009_p3 = por %p3008_p2, %p3007_p1 }
 0x203   :  { %v3745_v43 = vand.u32 4294901760, %v1237_v18  ;;  %v1240_v6 = vmax.f32 %v1230_v22, 0.0  ;;  %v1224_v34 = vadd.f32 %v1223_v41, %v1103_v1  ;;  %v3755_v13 = vsub.f32 %v1238_v23, %v3735_v44 }
 0x204   :  { %v3840_v23 = vsub.f32 %v1234_v17, %v3796_v21  ;;  %v3852_v60 = vand.u32 4294901760, %v3806_v55  ;;  %v1426_v22 = vand.u32 4294901760, %v3824_v3  ;;  %v1522_v54 = vsub.f32 %v3784_v24, %v3834_v15  ;;  %p3010_p4 = pnand %p3009_p3, %p3003_p0 }
 0x205   :  { %v3757_v62 = vand.u32 4294901760, %v1240_v6  ;;  %v1239_v4 = vmax.f32 %v1224_v34, 0.0  ;;  %v3771_v10 = vsub.f32 %v1237_v18, %v3745_v43  ;;  %v3794_v45 = vand.u32 4294901760, %v3755_v13 }
 0x206   :  { %v3858_v18 = vsub.f32 %v1233_v30, %v3820_v14  ;;  %v3867_v41 = vsub.f32 %v1313_v12, %v3826_v42  ;;  %v1408_v31 = vand.u32 4294901760, %v1407_v27  ;;  %v3876_v34 = vand.u32 4294901760, %v3840_v23 }
 0x207   :  { %v3774_v36 = vsub.f32 %v1240_v6, %v3757_v62  ;;  %v3776_v56 = vand.u32 4294901760, %v1239_v4  ;;  %2783 = vmatprep.subr.mxu0 %v3757_v62  ;;  %v3815_v26 = vand.u32 4294901760, %v3771_v10  ;;  %v1508_v20 = vsub.f32 %v3755_v13, %v3794_v45 }
 0x208   :  { %2784 = vmatpush3.msra.mxu0 %v3757_v62  ;;  %v1417_v6 = vsub.f32 %v3801_v5, %v1416_v7  ;;  %v1529_v25 = vsub.f32 %v3806_v55, %v3852_v60  ;;  %v1427_v8 = vsub.f32 %v3824_v3, %v1426_v22  ;;  %v3889_v17 = vand.u32 4294901760, %v3858_v18 }
 0x209   :  { %v3787_v35 = vsub.f32 %v1239_v4, %v3776_v56  ;;  %2785 = vmatprep.subr.mxu0 %v3776_v56  ;;  %v3791_v51 = vand.u32 4294901760, %v3774_v36  ;;  %v1515_v1 = vsub.f32 %v3771_v10, %v3815_v26  ;;  %v1509_v29 = vand.u32 4294901760, %v1508_v20 }
 0x20a   :  { %2786 = vmatpush3.msra.mxu0 %v3776_v56  ;;  %v3882_v4 = vand.u32 4294901760, %v1319_v39  ;;  %v1523_v52 = vand.u32 4294901760, %v1522_v54  ;;  %v1446_v30 = vand.u32 4294901760, %v3867_v41  ;;  %v3894_v12 = vsub.f32 %v1316_v58, %v3869_v50 }
 0x20b   :  { %2787 = vmatprep.subr.mxu0 %v3735_v44  ;;  %v1494_v11 = vsub.f32 %v3774_v36, %v3791_v51  ;;  %v3812_v9 = vand.u32 4294901760, %v3787_v35  ;;  %v1516_v37 = vand.u32 4294901760, %v1515_v1  ;;  %v1536_v28 = vsub.f32 %v3840_v23, %v3876_v34 }
 0x20c   :  { %2788 = vmatpush3.msra.mxu0 %v3735_v44  ;;  %v3903_v20 = vsub.f32 %v1319_v39, %v3882_v4  ;;  %v1428_v48 = vand.u32 4294901760, %v1427_v8  ;;  %v1543_v27 = vsub.f32 %v3858_v18, %v3889_v17  ;;  %v1447_v58 = vsub.f32 %v3867_v41, %v1446_v30 }
 0x20d   :  { %2789 = vmatprep.subr.mxu0 %v3745_v43  ;;  %v1495_v47 = vand.u32 4294901760, %v1494_v11  ;;  %v1501_v19 = vsub.f32 %v3787_v35, %v3812_v9  ;;  %v1418_v11 = vand.u32 4294901760, %v1417_v6  ;;  %v1537_v1 = vand.u32 4294901760, %v1536_v28 }
 0x20e   :  { %2790 = vmatpush3.msra.mxu0 %v3745_v43  ;;  %v1448_v54 = vand.u32 4294901760, %v1447_v58 }
 0x20f   :  { %2791 = vmatprep.subr.mxu0 %v3752_v40  ;;  %2811 = vmatprep.subr.mxu1 %v1495_v47  ;;  %v1502_v59 = vand.u32 4294901760, %v1501_v19  ;;  %v1437_v19 = vsub.f32 %v3855_v32, %v1436_v61 }
 0x210   :  { %2792 = vmatpush3.msra.mxu0 %v3752_v40  ;;  %2812 = vmatpush3.msra.mxu1 %v1495_v47  ;;  %v1530_v47 = vand.u32 4294901760, %v1529_v25 }
 0x211   :  { %2793 = vmatprep.subr.mxu0 %v3768_v49  ;;  %2813 = vmatprep.subr.mxu1 %v1502_v59  ;;  %v1438_v39 = vand.u32 4294901760, %v1437_v19 }
 0x212   :  { %2794 = vmatpush3.msra.mxu0 %v3768_v49  ;;  %2814 = vmatpush3.msra.mxu1 %v1502_v59  ;;  %v1456_v59 = vand.u32 4294901760, %v3894_v12 }
 0x213   :  { %2795 = vmatprep.subr.mxu0 %v3796_v21  ;;  %2815 = vmatprep.subr.mxu1 %v1509_v29 }
 0x214   :  { %2796 = vmatpush3.msra.mxu0 %v3796_v21  ;;  %2816 = vmatpush3.msra.mxu1 %v1509_v29  ;;  %v1466_v29 = vand.u32 4294901760, %v3903_v20 }
 0x215   :  { %2797 = vmatprep.subr.mxu0 %v3820_v14  ;;  %2817 = vmatprep.subr.mxu1 %v1516_v37 }
 0x216   :  { %2798 = vmatpush3.msra.mxu0 %v3820_v14  ;;  %2818 = vmatpush3.msra.mxu1 %v1516_v37 }
 0x217   :  { %2800 = vmatmul.mubr.f32.vlgmr.msra.gmra.mxu0 %v1408_v31  ;;  %2819 = vmatprep.subr.mxu1 %v1523_v52  ;;  %v1457_v31 = vsub.f32 %v3894_v12, %v1456_v59 }
 0x218   :  { %2839 = vmatprep.subr.mxu0 %v3774_v36  ;;  %2820 = vmatpush3.msra.mxu1 %v1523_v52 }
 0x219   :  { %2840 = vmatpush3.msra.mxu0 %v3774_v36  ;;  %2821 = vmatprep.subr.mxu1 %v1530_v47  ;;  %v1544_v36 = vand.u32 4294901760, %v1543_v27  ;;  %v1458_v6 = vand.u32 4294901760, %v1457_v31 }
 0x21a   :  { %2841 = vmatprep.subr.mxu0 %v3787_v35  ;;  %2802 = vmatprep.mubr.f32.mxu0 %v1418_v11 }
 0x21b   :  { %2822 = vmatpush3.msra.mxu1 %v1530_v47  ;;  %2842 = vmatpush3.msra.mxu0 %v3787_v35  ;;  %v1467_v35 = vsub.f32 %v3903_v20, %v1466_v29 }
 0x21c   :  { %2803 = vmatmul.mubr.f32.gmra.mxu0 %v1428_v48  ;;  %2823 = vmatprep.subr.mxu1 %v1537_v1 }
 0x21d   :  { %2843 = vmatprep.subr.mxu0 %v3755_v13  ;;  %2824 = vmatpush3.msra.mxu1 %v1537_v1 }
 0x21e   :  { %2844 = vmatpush3.msra.mxu0 %v3755_v13  ;;  %2825 = vmatprep.subr.mxu1 %v1544_v36  ;;  %v1468_v13 = vand.u32 4294901760, %v1467_v35 }
 0x21f   :  { %2845 = vmatprep.subr.mxu0 %v3771_v10  ;;  %2805 = vmatprep.mubr.f32.mxu0 %v1438_v39 }
 0x220   :  { %2826 = vmatpush3.msra.mxu1 %v1544_v36  ;;  %2846 = vmatpush3.msra.mxu0 %v3771_v10 }
 0x221   :  { %2806 = vmatmul.mubr.f32.gmra.mxu0 %v1448_v54  ;;  %2828 = vmatmul.mubr.f32.vlgmr.msra.gmra.mxu1 %v3742_v33 }
 0x222   :  { %2847 = vmatprep.subr.mxu0 %v3784_v24  ;;  %2867 = vmatprep.subr.mxu1 %v3757_v62 }
 0x223   :  { %2848 = vmatpush3.msra.mxu0 %v3784_v24  ;;  %2868 = vmatpush3.msra.mxu1 %v3757_v62 }
 0x224   :  { %2849 = vmatprep.subr.mxu0 %v3806_v55  ;;  %2869 = vmatprep.subr.mxu1 %v3776_v56 }
 0x225   :  { %2808 = vmatprep.mubr.f32.mxu0 %v1458_v6  ;;  %2830 = vmatprep.mubr.f32.mxu1 %v3765_v16 }
 0x226   :  { %2850 = vmatpush3.msra.mxu0 %v3806_v55  ;;  %2870 = vmatpush3.msra.mxu1 %v3776_v56 }
 0x227   :  { %2809 = vmatmul.mubr.f32.gmra.mxu0 %v1468_v13  ;;  %2831 = vmatmul.mubr.f32.gmra.mxu1 %v3780_v57 }
 0x228   :  { %2851 = vmatprep.subr.mxu0 %v3840_v23  ;;  %2871 = vmatprep.subr.mxu1 %v3735_v44 }
 0x229   :  { %2852 = vmatpush3.msra.mxu0 %v3840_v23  ;;  %2872 = vmatpush3.msra.mxu1 %v3735_v44 }
 0x22a   :  { %2853 = vmatprep.subr.mxu0 %v3858_v18  ;;  %2873 = vmatprep.subr.mxu1 %v3745_v43 }
 0x22b   :  { %2833 = vmatprep.mubr.f32.mxu1 %v3803_v63  ;;  %2854 = vmatpush3.msra.mxu0 %v3858_v18 }
 0x22c   :  { %2855 = vmatprep.mubr.f32.mxu0 %v3691_v46  ;;  %2874 = vmatpush3.msra.mxu1 %v3745_v43 }
 0x22d   :  { %2834 = vmatmul.mubr.f32.gmra.mxu1 %v3826_v42  ;;  %2856 = vmatmul.mubr.f32.vlgmr.msra.gmra.mxu0 %v3763_v0 }
 0x22e   :  { %2875 = vmatprep.subr.mxu1 %v3752_v40  ;;  %2895 = vmatprep.subr.mxu0 %v3791_v51 }
 0x22f   :  { %2876 = vmatpush3.msra.mxu1 %v3752_v40  ;;  %2896 = vmatpush3.msra.mxu0 %v3791_v51 }
 0x230   :  { %2877 = vmatprep.subr.mxu1 %v3768_v49  ;;  %2897 = vmatprep.subr.mxu0 %v3812_v9 }
 0x231   :  { %2836 = vmatprep.mubr.f32.mxu1 %v3869_v50  ;;  %2858 = vmatprep.mubr.f32.mxu0 %v3801_v5 }
 0x232   :  { %2878 = vmatpush3.msra.mxu1 %v3768_v49  ;;  %2898 = vmatpush3.msra.mxu0 %v3812_v9 }
 0x233   :  { %2837 = vmatmul.mubr.f32.gmra.mxu1 %v3882_v4  ;;  %2859 = vmatmul.mubr.f32.gmra.mxu0 %v3824_v3 }
 0x234   :  { %2879 = vmatprep.subr.mxu1 %v3796_v21  ;;  %2899 = vmatprep.subr.mxu0 %v3794_v45 }
 0x235   :  { %2880 = vmatpush3.msra.mxu1 %v3796_v21  ;;  %2900 = vmatpush3.msra.mxu0 %v3794_v45 }
 0x236   :  { %2881 = vmatprep.subr.mxu1 %v3820_v14  ;;  %2901 = vmatprep.subr.mxu0 %v3815_v26 }
 0x237   :  { %2861 = vmatprep.mubr.f32.mxu0 %v3855_v32  ;;  %2882 = vmatpush3.msra.mxu1 %v3820_v14 }
 0x238   :  { %2883 = vmatprep.mubr.f32.mxu1 %v1396_v53  ;;  %2902 = vmatpush3.msra.mxu0 %v3815_v26 }
 0x239   :  { %2862 = vmatmul.mubr.f32.gmra.mxu0 %v3867_v41  ;;  %2884 = vmatmul.mubr.f32.vlgmr.msra.gmra.mxu1 %v1406_v2 }
 0x23a   :  { %2903 = vmatprep.subr.mxu0 %v3834_v15  ;;  %2923 = vmatprep.subr.mxu1 %v3757_v62 }
 0x23b   :  { %2904 = vmatpush3.msra.mxu0 %v3834_v15  ;;  %2924 = vmatpush3.msra.mxu1 %v3757_v62  ;;  %v1265_v62 = vpop.permute.xlu0 %1264 }
 0x23c   :  { %2905 = vmatprep.subr.mxu0 %v3852_v60  ;;  %2925 = vmatprep.subr.mxu1 %v3776_v56 }
 0x23d   :  { %2864 = vmatprep.mubr.f32.mxu0 %v3894_v12  ;;  %2886 = vmatprep.mubr.f32.mxu1 %v1416_v7 }
 0x23e   :  { %2906 = vmatpush3.msra.mxu0 %v3852_v60  ;;  %2926 = vmatpush3.msra.mxu1 %v3776_v56 }
 0x23f   :  { %2865 = vmatmul.mubr.f32.gmra.mxu0 %v3903_v20  ;;  %2887 = vmatmul.mubr.f32.gmra.mxu1 %v1426_v22 }
 0x240   :  { %2907 = vmatprep.subr.mxu0 %v3876_v34  ;;  %2927 = vmatprep.subr.mxu1 %v3735_v44 }
 0x241   :  { %2908 = vmatpush3.msra.mxu0 %v3876_v34  ;;  %2928 = vmatpush3.msra.mxu1 %v3735_v44 }
 0x242   :  { %2909 = vmatprep.subr.mxu0 %v3889_v17  ;;  %2929 = vmatprep.subr.mxu1 %v3745_v43 }
 0x243   :  { %2889 = vmatprep.mubr.f32.mxu1 %v1436_v61  ;;  %2910 = vmatpush3.msra.mxu0 %v3889_v17 }
 0x244   :  { %2911 = vmatprep.mubr.f32.mxu0 %v3688_v38  ;;  %2930 = vmatpush3.msra.mxu1 %v3745_v43 }
 0x245   :  { %2890 = vmatmul.mubr.f32.gmra.mxu1 %v1446_v30  ;;  %2912 = vmatmul.mubr.f32.vlgmr.msra.gmra.mxu0 %v3742_v33 }
 0x246   :  { %2931 = vmatprep.subr.mxu1 %v3752_v40  ;;  %2892 = vmatprep.mubr.f32.mxu1 %v1456_v59 }
 0x247   :  { %2932 = vmatpush3.msra.mxu1 %v3752_v40  ;;  %2914 = vmatprep.mubr.f32.mxu0 %v3765_v16 }
 0x248   :  { %2933 = vmatprep.subr.mxu1 %v3768_v49 }
 0x249   :  { %2934 = vmatpush3.msra.mxu1 %v3768_v49  ;;  %2915 = vmatmul.mubr.f32.gmra.mxu0 %v3780_v57 }
 0x24a   :  { %2893 = vmatmul.mubr.f32.gmra.mxu1 %v1466_v29  ;;  %2935 = vmatprep.subr.mxu1 %v3796_v21 }
 0x24b   :  { %2936 = vmatpush3.msra.mxu1 %v3796_v21  ;;  %2917 = vmatprep.mubr.f32.mxu0 %v3803_v63 }
 0x24c   :  { %2937 = vmatprep.subr.mxu1 %v3820_v14  ;;  %2939 = vmatprep.mubr.f32.mxu1 %v3688_v38  ;;  %v1260_v38 = vpop.permute.xlu1 %1259 }
 0x24d   :  { %2938 = vmatpush3.msra.mxu1 %v3820_v14  ;;  %2918 = vmatmul.mubr.f32.gmra.mxu0 %v3826_v42 }
 0x24e   :  { %2940 = vmatmul.mubr.f32.vlgmr.msra.gmra.mxu1 %v3742_v33  ;;  %2920 = vmatprep.mubr.f32.mxu0 %v3869_v50 }
 0x24f   :  { %2942 = vmatprep.mubr.f32.mxu1 %v3765_v16  ;;  %v1275_v16 = vpop.permute.xlu0 %1274 }
 0x250   :  { %v4029_v46 = vpop.permute.xlu1 %1269 }
 0x251   :  { %2921 = vmatmul.mubr.f32.gmra.mxu0 %v3882_v4 }
 0x252   :  { %2943 = vmatmul.mubr.f32.gmra.mxu1 %v3780_v57 }
 0x253   :  { %2945 = vmatprep.mubr.f32.mxu1 %v3803_v63  ;;  %v4047_v56 = vpop.permute.xlu0 %1284 }
 0x254   :  { %v4031_v53 = vpop.permute.xlu1 %1279 }
 0x256   :  { %2946 = vmatmul.mubr.f32.gmra.mxu1 %v3826_v42 }
 0x257   :  { %2948 = vmatprep.mubr.f32.mxu1 %v3869_v50  ;;  %v4051_v45 = vpop.permute.xlu0 %1294 }
 0x258   :  { %v4033_v44 = vpop.permute.xlu1 %1289 }
 0x25a   :  { %2949 = vmatmul.mubr.f32.gmra.mxu1 %v3882_v4 }
 0x25b   :  { %v4055_v9 = vpop.permute.xlu0 %2183 }
 0x25c   :  { %v4035_v33 = vpop.permute.xlu1 %2178 }
 0x25f   :  { %v4059_v23 = vpop.permute.xlu0 %2193 }
 0x260   :  { %v4037_v43 = vpop.permute.xlu1 %2188  ;;  %4142 = vst [vmem:[#allocation8_spill] sm:$0xff] %v4059_v23 }
 0x263   :  { %v4063_v41 = vpop.permute.xlu0 %2203 }
 0x264   :  { %v4039_v40 = vpop.permute.xlu1 %2198  ;;  %4143 = vst [vmem:[#allocation9_spill] sm:$0xff] %v4063_v41 }
 0x265   :  { %4139 = vst [vmem:[#allocation5_spill] sm:$0xff] %v4039_v40 }
 0x267   :  { %v4067_v4 = vpop.permute.xlu0 %2213 }
 0x268   :  { %v4041_v0 = vpop.permute.xlu1 %2208  ;;  %4145 = vst [vmem:[#allocation11_spill] sm:$0xff] %v4067_v4 }
 0x269   :  { %4140 = vst [vmem:[#allocation6_spill] sm:$0xff] %v4041_v0 }
 0x26b   :  { %v4071_v30 = vpop.permute.xlu0 %2245 }
 0x26c   :  { %v4043_v49 = vpop.permute.xlu1 %2239 }
 0x26d   :  { %4141 = vst [vmem:[#allocation7_spill] sm:$0xff] %v4043_v49 }
 0x26f   :  { %v4075_v20 = vpop.permute.xlu0 %2253 }
 0x270   :  { %v4045_v10 = vpop.permute.xlu1 %2249 }
 0x273   :  { %v4079_v39 = vpop.permute.xlu0 %2257 }
 0x274   :  { %v4049_v51 = vpop.permute.xlu1 %2300  ;;  %4149 = vst [vmem:[#allocation15_spill] sm:$0xff] %v4079_v39 }
 0x277   :  { %v4081_v49 = vpop.permute.xlu0 %2367 }
 0x278   :  { %v4053_v5 = vpop.permute.xlu1 %2355  ;;  %4150 = vst [vmem:[#allocation16_spill] sm:$0xff] %v4081_v49 }
 0x27c   :  { %v4057_v3 = vpop.permute.xlu1 %2359 }
 0x280   :  { %v4061_v32 = vpop.permute.xlu1 %2308 }
 0x284   :  { %v4065_v37 = vpop.permute.xlu1 %2363 }
 0x285   :  { %4144 = vst [vmem:[#allocation10_spill] sm:$0xff] %v4065_v37 }
 0x288   :  { %v4069_v52 = vpop.permute.xlu1 %2312 }
 0x289   :  { %4146 = vst [vmem:[#allocation12_spill] sm:$0xff] %v4069_v52 }
 0x28c   :  { %v4073_v19 = vpop.permute.xlu1 %2261 }
 0x28d   :  { %4147 = vst [vmem:[#allocation13_spill] sm:$0xff] %v4073_v19 }
 0x290   :  { %v4077_v1 = vpop.permute.xlu1 %2316 }
 0x291   :  { %4148 = vst [vmem:[#allocation14_spill] sm:$0xff] %v4077_v1 }
 0x294   :  { %v4083_v41 = vpop.permute.xlu1 %2265 }
 0x2d7   :  { %v2801_v57 = vpop.f32.mrf.mxu0 }
 0x2d8   :  { %v1411_v29 = vadd.f32 %v2801_v57, %v1265_v62 }
 0x2d9   :  { %v1400_v24 = vpop.f32.mrf.mxu0 }
 0x2da   :  { %v1401_v31 = vadd.f32 %v1400_v24, %v1260_v38 }
 0x2dc   :  { %v2804_v21 = vpop.f32.mrf.mxu0 }
 0x2dd   :  { %v1431_v40 = vadd.f32 %v2804_v21, %v1275_v16 }
 0x2de   :  { %v1420_v2 = vpop.f32.mrf.mxu0 }
 0x2df   :  { %v1421_v1 = vadd.f32 %v1420_v2, %v4029_v46 }
 0x2e1   :  { %v2807_v63 = vpop.f32.mrf.mxu0  ;;  %v2829_v55 = vpop.f32.mrf.mxu1 }
 0x2e2   :  { %v1588_v35 = vadd.f32 %v2829_v55, %v1411_v29  ;;  %v1451_v38 = vadd.f32 %v2807_v63, %v4047_v56 }
 0x2e3   :  { %v1440_v26 = vpop.f32.mrf.mxu0  ;;  %v1581_v14 = vpop.f32.mrf.mxu1 }
 0x2e4   :  { %v1582_v4 = vadd.f32 %v1581_v14, %v1401_v31  ;;  %v1441_v14 = vadd.f32 %v1440_v26, %v4031_v53  ;;  %v4090_v31 = vpop.permute.xlu0 %2371 }
 0x2e7   :  { %v2810_v42 = vpop.f32.mrf.mxu0  ;;  %v2832_v15 = vpop.f32.mrf.mxu1 }
 0x2e8   :  { %v1600_v57 = vadd.f32 %v2832_v15, %v1431_v40  ;;  %v4092_v15 = vpop.permute.xlu1 %2375 }
 0x2e9   :  { %v1460_v7 = vpop.f32.mrf.mxu0  ;;  %v1593_v60 = vpop.f32.mrf.mxu1 }
 0x2ea   :  { %v1594_v24 = vadd.f32 %v1593_v60, %v1421_v1  ;;  %v1461_v16 = vadd.f32 %v1460_v7, %v4033_v44 }
 0x2ed   :  { %v2835_v18 = vpop.f32.mrf.mxu1  ;;  %v2857_v22 = vpop.f32.mrf.mxu0 }
 0x2ee   :  { %v1719_v0 = vadd.f32 %v2857_v22, %v1588_v35  ;;  %v1471_v22 = vadd.f32 %v2810_v42, %v4051_v45  ;;  %v2305_v35 = vpop.permute.xlu0 %2304 }
 0x2ef   :  { %v1605_v50 = vpop.f32.mrf.mxu1  ;;  %v1711_v34 = vpop.f32.mrf.mxu0 }
 0x2f0   :  { %v1712_v52 = vadd.f32 %v1711_v34, %v1582_v4  ;;  %v1606_v60 = vadd.f32 %v1605_v50, %v1441_v14 }
 0x2f3   :  { %v2838_v25 = vpop.f32.mrf.mxu1  ;;  %v2860_v61 = vpop.f32.mrf.mxu0 }
 0x2f4   :  { %v1733_v21 = vadd.f32 %v2860_v61, %v1600_v57  ;;  %v1624_v34 = vadd.f32 %v2838_v25, %v1471_v22 }
 0x2f5   :  { %v1617_v8 = vpop.f32.mrf.mxu1  ;;  %v1725_v17 = vpop.f32.mrf.mxu0 }
 0x2f6   :  { %v1726_v2 = vadd.f32 %v1725_v17, %v1594_v24  ;;  %v1618_v53 = vadd.f32 %v1617_v8, %v1461_v16 }
 0x2f9   :  { %v2863_v12 = vpop.f32.mrf.mxu0  ;;  %v2885_v11 = vpop.f32.mrf.mxu1 }
 0x2fa   :  { %v1850_v39 = vadd.f32 %v2885_v11, %v1719_v0  ;;  %v1612_v0 = vadd.f32 %v2835_v18, %v1451_v38 }
 0x2fb   :  { %v1739_v28 = vpop.f32.mrf.mxu0  ;;  %v1841_v47 = vpop.f32.mrf.mxu1 }
 0x2fc   :  { %v1842_v55 = vadd.f32 %v1841_v47, %v1712_v52  ;;  %v1747_v26 = vadd.f32 %v2863_v12, %v1612_v0  ;;  %v1740_v44 = vadd.f32 %v1739_v28, %v1606_v60  ;;  %v4094_v12 = vpop.permute.xlu1 %2269 }
 0x2ff   :  { %v2866_v48 = vpop.f32.mrf.mxu0  ;;  %v2888_v27 = vpop.f32.mrf.mxu1 }
 0x300   :  { %v1866_v4 = vadd.f32 %v2888_v27, %v1733_v21  ;;  %v1761_v7 = vadd.f32 %v2866_v48, %v1624_v34  ;;  %v2321_v21 = vpop.permute.xlu0 %2320  ;;  %v2380_v34 = vpop.permute.xlu1 %2379 }
 0x301   :  { %v1753_v58 = vpop.f32.mrf.mxu0  ;;  %v1857_v59 = vpop.f32.mrf.mxu1 }
 0x302   :  { %v1858_v45 = vadd.f32 %v1857_v59, %v1726_v2  ;;  %v1754_v18 = vadd.f32 %v1753_v58, %v1618_v53  ;;  %v4151_v2 = vld [vmem:[#allocation8_spill] sm:$0xff] }
 0x305   :  { %v2891_v36 = vpop.f32.mrf.mxu1  ;;  %v2913_v54 = vpop.f32.mrf.mxu0 }
 0x306   :  { %v1999_v29 = vadd.f32 %v2913_v54, %v1850_v39  ;;  %v1882_v17 = vadd.f32 %v2891_v36, %v1747_v26 }
 0x307   :  { %v1873_v6 = vpop.f32.mrf.mxu1  ;;  %v1992_v13 = vpop.f32.mrf.mxu0 }
 0x308   :  { %v1993_v40 = vadd.f32 %v1992_v13, %v1842_v55  ;;  %v1874_v54 = vadd.f32 %v1873_v6, %v1740_v44 }
 0x309   :  { %v2916_v19 = vpop.f32.mrf.mxu0 }
 0x30a   :  { %v2894_v37 = vpop.f32.mrf.mxu1  ;;  %v2011_v61 = vadd.f32 %v2916_v19, %v1866_v4 }
 0x30b   :  { %v2004_v62 = vpop.f32.mrf.mxu0  ;;  %v1898_v27 = vadd.f32 %v2894_v37, %v1761_v7 }
 0x30c   :  { %v1889_v23 = vpop.f32.mrf.mxu1  ;;  %v2005_v1 = vadd.f32 %v2004_v62, %v1858_v45 }
 0x30d   :  { %v2919_v49 = vpop.f32.mrf.mxu0  ;;  %v1890_v57 = vadd.f32 %v1889_v23, %v1754_v18 }
 0x30e   :  { %v2941_v46 = vpop.f32.mrf.mxu1  ;;  %v2023_v8 = vadd.f32 %v2919_v49, %v1882_v17  ;;  %v4156_v17 = vld [vmem:[#allocation5_spill] sm:$0xff] }
 0x30f   :  { %v2120_v56 = vadd.f32 %v2941_v46, %v1999_v29  ;;  %v2016_v63 = vpop.f32.mrf.mxu0 }
 0x310   :  { %v2113_v52 = vpop.f32.mrf.mxu1  ;;  %v2017_v28 = vadd.f32 %v2016_v63, %v1874_v54  ;;  %v4153_v63 = vld [vmem:[#allocation10_spill] sm:$0xff] }
 0x311   :  { %v2114_v42 = vadd.f32 %v2113_v52, %v1993_v40  ;;  %v2922_v11 = vpop.f32.mrf.mxu0  ;;  %v2160_v39 = vmax.f32 %v2120_v56, 0.0 }
 0x312   :  { %v2944_v47 = vpop.f32.mrf.mxu1  ;;  %v2035_v55 = vadd.f32 %v2922_v11, %v1898_v27  ;;  %v4159_v27 = vld [vmem:[#allocation9_spill] sm:$0xff] }
 0x313   :  { %v2159_v13 = vmax.f32 %v2114_v42, 0.0  ;;  %v2132_v50 = vadd.f32 %v2944_v47, %v2011_v61  ;;  %v2028_v36 = vpop.f32.mrf.mxu0  ;;  %v2217_v6 = vmul.f32 %v4055_v9, %v2160_v39  ;;  %v2277_v38 = vmul.f32 %v4045_v10, %v2160_v39  ;;  %v4155_v47 = vld [vmem:[#allocation16_spill] sm:$0xff] }
 0x314   :  { %v2125_v25 = vpop.f32.mrf.mxu1  ;;  %v2332_v23 = vmul.f32 %v2305_v35, %v2160_v39  ;;  %v2387_v49 = vmul.f32 %v4057_v3, %v2160_v39  ;;  %v2029_v16 = vadd.f32 %v2028_v36, %v1890_v57  ;;  %v4152_v3 = vld [vmem:[#allocation12_spill] sm:$0xff]  ;;  %v4157_v39 = vld [vmem:[#allocation13_spill] sm:$0xff]  ;;  %v4158_v35 = vld [vmem:[#allocation14_spill] sm:$0xff] }
 0x315   :  { %v2126_v59 = vadd.f32 %v2125_v25, %v2005_v1  ;;  %v2216_v19 = vmul.f32 %v4035_v33, %v2159_v13  ;;  %v2276_v48 = vmul.f32 %v4071_v30, %v2159_v13  ;;  %v2331_v58 = vmul.f32 %v4049_v51, %v2159_v13  ;;  %v2325_v25 = vpop.permute.xlu0 %2324 }
 0x316   :  { %v2947_v62 = vpop.f32.mrf.mxu1  ;;  %v2162_v24 = vmax.f32 %v2132_v50, 0.0  ;;  %v2386_v30 = vmul.f32 %v4053_v5, %v2159_v13 }
 0x317   :  { %v2161_v37 = vmax.f32 %v2126_v59, 0.0  ;;  %v2144_v29 = vadd.f32 %v2947_v62, %v2023_v8  ;;  %v2224_v22 = vadd.f32 %v2217_v6, %v2216_v19  ;;  %v2284_v33 = vadd.f32 %v2277_v38, %v2276_v48  ;;  %v4160_v6 = vld [vmem:[#allocation6_spill] sm:$0xff] }
 0x318   :  { %v2137_v14 = vpop.f32.mrf.mxu1  ;;  %v2339_v51 = vadd.f32 %v2332_v23, %v2331_v58  ;;  %v2219_v40 = vmul.f32 %v4151_v2, %v2162_v24  ;;  %v2334_v56 = vmul.f32 %v4152_v3, %v2162_v24  ;;  %v2394_v42 = vadd.f32 %v2387_v49, %v2386_v30  ;;  %v2329_v58 = vpop.permute.xlu1 %2328 }
 0x319   :  { %v2218_v46 = vmul.f32 %v4037_v43, %v2161_v37  ;;  %v2278_v9 = vmul.f32 %v4075_v20, %v2161_v37  ;;  %v2333_v10 = vmul.f32 %v4061_v32, %v2161_v37  ;;  %v2388_v60 = vmul.f32 %v4153_v63, %v2161_v37  ;;  %v4154_v20 = vld [vmem:[#allocation15_spill] sm:$0xff] }
 0x31a   :  { %v2950_v0 = vpop.f32.mrf.mxu1  ;;  %v2138_v4 = vadd.f32 %v2137_v14, %v2017_v28  ;;  %v2164_v53 = vmax.f32 %v2144_v29, 0.0  ;;  %v2279_v7 = vmul.f32 %v4154_v20, %v2162_v24  ;;  %v2389_v18 = vmul.f32 %v4155_v47, %v2162_v24  ;;  %v4161_v14 = vld [vmem:[#allocation11_spill] sm:$0xff] }
 0x31b   :  { %v2225_v52 = vadd.f32 %v2224_v22, %v2218_v46  ;;  %v2340_v5 = vadd.f32 %v2339_v51, %v2333_v10  ;;  %v2156_v26 = vadd.f32 %v2950_v0, %v2035_v55  ;;  %v2285_v43 = vadd.f32 %v2284_v33, %v2278_v9  ;;  %v2274_v33 = vpop.permute.xlu0 %2273 }
 0x31c   :  { %v2149_v45 = vpop.f32.mrf.mxu1  ;;  %v2163_v44 = vmax.f32 %v2138_v4, 0.0  ;;  %v2395_v50 = vadd.f32 %v2394_v42, %v2388_v60  ;;  %v2221_v57 = vmul.f32 %v4159_v27, %v2164_v53  ;;  %v2336_v28 = vmul.f32 %v2321_v21, %v2164_v53  ;;  %v2384_v3 = vpop.permute.xlu1 %2383 }
 0x31d   :  { %v2226_v32 = vadd.f32 %v2225_v52, %v2219_v40  ;;  %v2341_v61 = vadd.f32 %v2340_v5, %v2334_v56  ;;  %v2150_v11 = vadd.f32 %v2149_v45, %v2029_v16  ;;  %v2166_v8 = vmax.f32 %v2156_v26, 0.0 }
 0x31e   :  { %v2220_v1 = vmul.f32 %v4156_v17, %v2163_v44  ;;  %v2280_v54 = vmul.f32 %v4157_v39, %v2163_v44  ;;  %v2335_v13 = vmul.f32 %v4158_v35, %v2163_v44  ;;  %v2286_v36 = vadd.f32 %v2285_v43, %v2279_v7 }
 0x31f   :  { %v2165_v59 = vmax.f32 %v2150_v11, 0.0  ;;  %v2390_v62 = vmul.f32 %v4090_v31, %v2163_v44  ;;  %v2281_v37 = vmul.f32 %v4083_v41, %v2164_v53  ;;  %v2223_v22 = vmul.f32 %v4161_v14, %v2166_v8 }
 0x320   :  { %v2227_v19 = vadd.f32 %v2226_v32, %v2220_v1  ;;  %v2342_v48 = vadd.f32 %v2341_v61, %v2335_v13  ;;  %v2287_v29 = vadd.f32 %v2286_v36, %v2280_v54  ;;  %v2396_v30 = vadd.f32 %v2395_v50, %v2389_v18  ;;  %v4162_v13 = vld [vmem:[#allocation7_spill] sm:$0xff] }
 0x321   :  { %v2222_v38 = vmul.f32 %v4160_v6, %v2165_v59  ;;  %v2337_v24 = vmul.f32 %v2325_v25, %v2165_v59  ;;  %v2282_v55 = vmul.f32 %v4094_v12, %v2165_v59  ;;  %v2338_v16 = vmul.f32 %v2329_v58, %v2166_v8 }
 0x322   :  { %v2228_v23 = vadd.f32 %v2227_v19, %v2221_v57  ;;  %v2343_v49 = vadd.f32 %v2342_v48, %v2336_v28  ;;  %v2288_v46 = vadd.f32 %v2287_v29, %v2281_v37  ;;  %v2391_v31 = vmul.f32 %v4092_v15, %v2164_v53 }
 0x323   :  { %v2392_v9 = vmul.f32 %v2380_v34, %v2165_v59  ;;  %v2397_v10 = vadd.f32 %v2396_v30, %v2390_v62  ;;  %v2283_v41 = vmul.f32 %v2274_v33, %v2166_v8  ;;  %v2393_v4 = vmul.f32 %v2384_v3, %v2166_v8 }
 0x324   :  { %v2229_v51 = vadd.f32 %v2228_v23, %v2222_v38  ;;  %v2344_v21 = vadd.f32 %v2343_v49, %v2337_v24  ;;  %v2289_v40 = vadd.f32 %v2288_v46, %v2282_v55 }
 0x325   :  { %v2398_v56 = vadd.f32 %v2397_v10, %v2391_v31 }
 0x326   :  { %v2230_v0 = vadd.f32 %v2229_v51, %v2223_v22  ;;  %v2345_v2 = vadd.f32 %v2344_v21, %v2338_v16  ;;  %v2290_v60 = vadd.f32 %v2289_v40, %v2283_v41 }
 0x327   :  { %v2399_v52 = vadd.f32 %v2398_v56, %v2392_v9 }
 0x328   :  { %v2231_v12 = vrot.slane %v2230_v0, 4  ;;  %v2346_v63 = vrot.slane %v2345_v2, 4  ;;  %v2291_v5 = vrot.slane %v2290_v60, 4 }
 0x329   :  { %v2400_v42 = vadd.f32 %v2399_v52, %v2393_v4 }
 0x32a   :  { %v2232_v26 = vadd.f32 %v2231_v12, %v2230_v0  ;;  %v2347_v45 = vadd.f32 %v2346_v63, %v2345_v2  ;;  %v2292_v43 = vadd.f32 %v2291_v5, %v2290_v60 }
 0x32b   :  { %v2401_v34 = vrot.slane %v2400_v42, 4 }
 0x32c   :  { %v2233_v44 = vrot.slane %v2232_v26, 2  ;;  %v2348_v15 = vrot.slane %v2347_v45, 2  ;;  %v2293_v53 = vrot.slane %v2292_v43, 2 }
 0x32d   :  { %v2402_v32 = vadd.f32 %v2401_v34, %v2400_v42 }
 0x32e   :  { %v2234_v20 = vadd.f32 %v2233_v44, %v2232_v26  ;;  %v2349_v7 = vadd.f32 %v2348_v15, %v2347_v45  ;;  %v2294_v61 = vadd.f32 %v2293_v53, %v2292_v43 }
 0x32f   :  { %v2403_v18 = vrot.slane %v2402_v32, 2 }
 0x330   :  { %v2235_v11 = vrot.slane %v2234_v20, 1  ;;  %v2350_v47 = vrot.slane %v2349_v7, 1  ;;  %v2295_v17 = vrot.slane %v2294_v61, 1 }
 0x331   :  { %v2404_v54 = vadd.f32 %v2403_v18, %v2402_v32 }
 0x332   :  { %v2236_v1 = vadd.f32 %v2235_v11, %v2234_v20  ;;  %v2351_v39 = vadd.f32 %v2350_v47, %v2349_v7  ;;  %v2296_v35 = vadd.f32 %v2295_v17, %v2294_v61 }
 0x333   :  { %v2405_v27 = vrot.slane %v2404_v54, 1 }
 0x334   :  { %v2242_v50 = vadd.f32 %v4162_v13, %v2236_v1  ;;  %v2352_v25 = vadd.f32 %v2351_v39, %v4162_v13  ;;  %v2297_v57 = vadd.f32 %v2296_v35, %v4162_v13 }
 0x335   :  { %v2406_v8 = vadd.f32 %v2405_v27, %v2404_v54 }
 0x336   :  { %2243 = vst [vmem:[#allocation2] sm:$0x1] %v2242_v50  ;;  %2353 = vst [vmem:[#allocation2] sm:$0x4] %v2352_v25 }
 0x337   :  { %2298 = vst [vmem:[#allocation2] sm:$0x2] %v2297_v57  ;;  %v2407_v59 = vadd.f32 %v2406_v8, %v4162_v13 }
 0x339   :  { %2408 = vst [vmem:[#allocation2] sm:$0x8] %v2407_v59 }
 0x33a   :  { %3013 = shalt.err (!%p3010_p4)
}
 0x33b   :  { %2418 = dma.vmem_to_hbm [thread:$0]  %s2416_s24, 64, %s4137_s9, [#allocation3]  }
 0x33c   :  { %3022 = dma.done.wait [#allocation3], 64  }
 0x33d   :  { %3023 = vsyncadd [#allocation3], 4294967232 }
 0x33e   :  { %2422 = vsyncpa [#allocation3], 1 }

</bundles_post_ra>
